<compile_context>
chip_gen: v7x
topology: tpu7x:2x2x1
jax: 0.10.0
libtpu: 0.0.40
codegen_flags: <defaults>
</compile_context>

<pallas_src>
import math

import numpy as np
import jax
import jax.numpy as jnp
from jax import lax
from jax.experimental import pallas as pl
from jax.experimental.pallas import tpu as pltpu

EPS = 1e-5  # PyTorch GroupNorm default eps


def _res_block_body(H, W, gsize1, gsize2,
                    x_ref, tproj_ref,
                    g1_ref, be1_ref, w1_ref, b1_ref,
                    g2_ref, be2_ref, w2_ref, b2_ref,
                    wsc_ref, bsc_ref, o_ref, pad1_ref, pad2_ref):
    HW = H * W
    x_bf = x_ref[0]                               # (HW, Cin) bf16
    xb = x_bf.astype(jnp.float32)                 # f32 copy for GN stats / identity shortcut

    # ---- in-kernel boundary column masks (f32 iota math is exact for these ranges) ----
    r_flat = lax.broadcasted_iota(jnp.int32, (HW, 1), 0).astype(jnp.float32)
    jcol = r_flat - jnp.floor(r_flat / float(W)) * float(W)       # column index j, exact
    col_a = jnp.where(jcol > 0.5, 1.0, 0.0).astype(jnp.float32)   # 1 where j != 0
    col_b = jnp.where(jcol < float(W) - 1.5, 1.0, 0.0).astype(jnp.float32)  # 1 where j != W-1

    ones_row = jnp.ones((1, HW), jnp.float32)

    def group_mat(C, gsize):
        # (C, C) 0/1 block-diagonal group-membership matrix, built in-kernel.
        rg = jnp.floor(lax.broadcasted_iota(jnp.int32, (C, C), 0).astype(jnp.float32)
                       / float(gsize))
        cg = jnp.floor(lax.broadcasted_iota(jnp.int32, (C, C), 1).astype(jnp.float32)
                       / float(gsize))
        return jnp.where(rg == cg, 1.0, 0.0).astype(jnp.float32)

    def swish_exact(y):
        # y * sigmoid(y); exp sits on the EUP slot, divide is full precision.
        return y * (1.0 / (1.0 + jnp.exp(-y)))

    def group_norm_swish(h, gsize, gamma_ref, beta_ref):
        # Per-channel sum / sum-of-squares on the MXU (fine for per-image blocks;
        # a VPU sublane accumulation would be preferable once row-band tiling exists).
        C = h.shape[1]
        n = float(HW * gsize)
        s = jnp.dot(ones_row, h, preferred_element_type=jnp.float32)        # (1, C)
        ss = jnp.dot(ones_row, h * h, preferred_element_type=jnp.float32)   # (1, C)
        st = jnp.concatenate([s, ss], axis=0)                               # (2, C)
        g = jnp.dot(st, group_mat(C, gsize), preferred_element_type=jnp.float32)
        mean = g[0:1] * (1.0 / n)
        var = jnp.maximum(g[1:2] * (1.0 / n) - mean * mean, 0.0)
        inv = lax.rsqrt(var + EPS)
        scale = inv * gamma_ref[...]
        shift = beta_ref[...] - mean * scale
        return swish_exact(h * scale + shift)

    def conv3x3(h, pad_ref, w_ref, b_ref):
        # h: (HW, C) f32.  Build one lane-concatenated slab [dx=-1 | dx=0 | dx=+1]
        # (column-masked +-1 shifts), cast once to bf16, and write it at row offset W
        # into the zero-padded scratch.  The three kernel-row matmuls then read static
        # slices at row offsets 0 / W / 2W; zero pad rows handle the top/bottom edges.
        C = h.shape[1]
        hA = h * col_a                                   # zero j==0 sources (dx = +1 tap)
        hB = h * col_b                                   # zero j==W-1 sources (dx = -1 tap)
        left = pltpu.roll(hB, shift=1, axis=0)           # out[r] = h[r-1]  (dx = -1, kx = 0)
        right = pltpu.roll(hA, shift=HW - 1, axis=0)     # out[r] = h[r+1]  (dx = +1, kx = 2)
        c0 = jnp.concatenate([left, h, right], axis=1).astype(jnp.bfloat16)   # (HW, 3C) bf16

        zpad = jnp.zeros((W, 3 * C), jnp.bfloat16)
        # Static row offsets (0, W, W+HW) -- multiples of 8 for the shapes used here,
        # so all sublane stores/loads are aligned.
        pad_ref[pl.ds(0, W), :] = zpad
        pad_ref[pl.ds(W + HW, W), :] = zpad
        pad_ref[pl.ds(W, HW), :] = c0

        acc = jnp.dot(pad_ref[pl.ds(0, HW), :], w_ref[0],           # ky = 0 (row i-1)
                      preferred_element_type=jnp.float32)
        acc = acc + jnp.dot(pad_ref[pl.ds(W, HW), :], w_ref[1],     # ky = 1 (row i)
                            preferred_element_type=jnp.float32)
        acc = acc + jnp.dot(pad_ref[pl.ds(2 * W, HW), :], w_ref[2],  # ky = 2 (row i+1)
                            preferred_element_type=jnp.float32)
        return acc + b_ref[...]

    # block1: GroupNorm(32, Cin) -> Swish -> Conv3x3(Cin -> Cout)
    h = group_norm_swish(xb, gsize1, g1_ref, be1_ref)
    h = conv3x3(h, pad1_ref, w1_ref, b1_ref)

    # temb projection (Swish -> Linear) precomputed in XLA; broadcast over spatial dims
    h = h + tproj_ref[0]

    # block2: GroupNorm(32, Cout) -> Swish -> Dropout(eval => identity) -> Conv3x3
    h = group_norm_swish(h, gsize2, g2_ref, be2_ref)
    h = conv3x3(h, pad2_ref, w2_ref, b2_ref)

    # shortcut: 1x1 conv when Cin != Cout, else identity
    if wsc_ref is not None:
        sc = jnp.dot(x_bf, wsc_ref[...], preferred_element_type=jnp.float32) + bsc_ref[...]
    else:
        sc = xb

    o_ref[0] = (h + sc).astype(o_ref.dtype)


def _make_kernel(H, W, gsize1, gsize2, use_shortcut_conv):
    if use_shortcut_conv:
        def kernel(x_ref, tproj_ref,
                   g1_ref, be1_ref, w1_ref, b1_ref,
                   g2_ref, be2_ref, w2_ref, b2_ref,
                   wsc_ref, bsc_ref, o_ref, pad1_ref, pad2_ref):
            _res_block_body(H, W, gsize1, gsize2, x_ref, tproj_ref,
                            g1_ref, be1_ref, w1_ref, b1_ref,
                            g2_ref, be2_ref, w2_ref, b2_ref,
                            wsc_ref, bsc_ref, o_ref, pad1_ref, pad2_ref)
    else:
        def kernel(x_ref, tproj_ref,
                   g1_ref, be1_ref, w1_ref, b1_ref,
                   g2_ref, be2_ref, w2_ref, b2_ref,
                   o_ref, pad1_ref, pad2_ref):
            _res_block_body(H, W, gsize1, gsize2, x_ref, tproj_ref,
                            g1_ref, be1_ref, w1_ref, b1_ref,
                            g2_ref, be2_ref, w2_ref, b2_ref,
                            None, None, o_ref, pad1_ref, pad2_ref)
    return kernel


def res_block_pallas(x_nchw, temb, params):
    B, Cin, H, W = x_nchw.shape
    Cout = params["w1"].shape[-1]
    HW = H * W
    use_sc = (Cin != Cout)

    # TODO(synk): in a full UNet keep activations NHWC bf16 end-to-end across ResBlocks
    # to avoid these per-call transposes and the final f32 upcast.
    x = jnp.transpose(x_nchw, (0, 2, 3, 1)).reshape(B, HW, Cin).astype(jnp.bfloat16)

    # temb_proj (Swish -> Linear) as one batched XLA matmul: (B, tdim) @ (tdim, Cout)
    t = temb.astype(jnp.float32)
    t = t * jax.nn.sigmoid(t)
    tproj = (t @ params["wt"] + params["bt"]).reshape(B, 1, Cout).astype(jnp.float32)

    kernel = _make_kernel(H, W, Cin // 32, Cout // 32, use_sc)

    def full(shape):
        return pl.BlockSpec(shape, lambda b, _n=len(shape): (0,) * _n)

    in_specs = [
        pl.BlockSpec((1, HW, Cin), lambda b: (b, 0, 0)),     # x (bf16)
        pl.BlockSpec((1, 1, Cout), lambda b: (b, 0, 0)),     # temb projection (f32)
        full((1, Cin)), full((1, Cin)),                      # gn1 gamma / beta
        full((3, 3 * Cin, Cout)), full((1, Cout)),           # conv1 w (bf16, row-grouped) / b
        full((1, Cout)), full((1, Cout)),                    # gn2 gamma / beta
        full((3, 3 * Cout, Cout)), full((1, Cout)),          # conv2 w (bf16) / b
    ]
    args = [x, tproj,
            params["gn1_w"], params["gn1_b"], params["w1"], params["b1"],
            params["gn2_w"], params["gn2_b"], params["w2"], params["b2"]]
    if use_sc:
        in_specs += [full((Cin, Cout)), full((1, Cout))]     # shortcut 1x1 w (bf16) / b
        args += [params["wsc"], params["bsc"]]

    out_spec = pl.BlockSpec((1, HW, Cout), lambda b: (b, 0, 0))

    # zero-padded bf16 conv slabs (one per conv), persistent VMEM scratch
    scratch_shapes = [pltpu.VMEM((HW + 2 * W, 3 * Cin), jnp.bfloat16),
                      pltpu.VMEM((HW + 2 * W, 3 * Cout), jnp.bfloat16)]

    # Generation-aware VMEM budget: 75% of physical VMEM (~48 MiB on v7x, ~96 MiB v5e/v6e).
    try:
        vmem_cap = int(pltpu.get_tpu_info().vmem_capacity_bytes)
    except Exception:
        vmem_cap = 64 * 2 ** 20
    est = (2 * (HW * Cin * 2 + HW * Cout * 2 + Cout * 4)                       # x / out / tproj blocks (x2 bufs)
           + 2 * 2 * (9 * Cin * Cout + 9 * Cout * Cout + Cin * Cout)           # bf16 weights (x2 bufs)
           + 2 * 8 * (Cin + Cout) * 4                                          # small gamma/beta/bias params
           + (HW + 2 * W) * 3 * (Cin + Cout) * 2                               # padded bf16 conv scratch
           + 8 * HW * max(Cin, Cout) * 4                                       # live f32 intermediates
           + (Cin * Cin + Cout * Cout) * 4)                                    # in-kernel group matrices
    vmem_limit = int(min(int(vmem_cap * 0.75), max(2 * est, 32 * 2 ** 20)))
    # TODO(synk): for large H*W the per-batch block will not fit -- needs row-band tiling
    # (grid axis over HW bands with W-row halo) and a two-pass GroupNorm.

    out = pl.pallas_call(
        kernel,
        out_shape=jax.ShapeDtypeStruct((B, HW, Cout), jnp.bfloat16),
        grid_spec=pltpu.PrefetchScalarGridSpec(
            num_scalar_prefetch=0,
            grid=(B,),
            in_specs=in_specs,
            out_specs=out_spec,
            scratch_shapes=scratch_shapes,
        ),
        compiler_params=pltpu.CompilerParams(
            dimension_semantics=("parallel",),
            vmem_limit_bytes=vmem_limit),
    )(*args)

    out = out.astype(jnp.float32)
    return jnp.transpose(out.reshape(B, H, W, Cout), (0, 3, 1, 2))


def _xavier_uniform(key, shape, fan_in, fan_out, gain=1.0):
    bound = gain * math.sqrt(6.0 / (fan_in + fan_out))
    return jax.random.uniform(key, shape, jnp.float32, -bound, bound)


def init_params(key, in_ch, out_ch, tdim):
    k1, k2, k3, k4 = jax.random.split(key, 4)
    # conv1: torch weight (out_ch, in_ch, 3, 3), xavier_uniform, zero bias.
    # Stored row-grouped for the kernel: (ky, kx*Cin + cin, cout), bf16.
    w1_t = _xavier_uniform(k1, (out_ch, in_ch, 3, 3), in_ch * 9, out_ch * 9)
    w1 = jnp.transpose(w1_t, (2, 3, 1, 0)).reshape(3, 3 * in_ch, out_ch).astype(jnp.bfloat16)
    # temb linear: torch (out_ch, tdim); used in the XLA wrapper, kept f32
    wt_t = _xavier_uniform(k2, (out_ch, tdim), tdim, out_ch)
    # conv2 (block2[-1]): xavier_uniform with gain=1e-5
    w2_t = _xavier_uniform(k3, (out_ch, out_ch, 3, 3), out_ch * 9, out_ch * 9, gain=1e-5)
    w2 = jnp.transpose(w2_t, (2, 3, 1, 0)).reshape(3, 3 * out_ch, out_ch).astype(jnp.bfloat16)
    # shortcut 1x1 conv
    wsc_t = _xavier_uniform(k4, (out_ch, in_ch, 1, 1), in_ch, out_ch)

    return dict(
        w1=w1, b1=jnp.zeros((1, out_ch), jnp.float32),
        wt=wt_t.T, bt=jnp.zeros((1, out_ch), jnp.float32),
        w2=w2, b2=jnp.zeros((1, out_ch), jnp.float32),
        wsc=wsc_t[:, :, 0, 0].T.astype(jnp.bfloat16),
        bsc=jnp.zeros((1, out_ch), jnp.float32),
        gn1_w=jnp.ones((1, in_ch), jnp.float32), gn1_b=jnp.zeros((1, in_ch), jnp.float32),
        gn2_w=jnp.ones((1, out_ch), jnp.float32), gn2_b=jnp.zeros((1, out_ch), jnp.float32),
    )


def ref_forward(x, temb, p, in_ch, out_ch):
    """Pure-JAX f32 reference mirroring the PyTorch forward (eval mode)."""
    dn = ("NCHW", "HWIO", "NCHW")

    def gn_swish(h, C, w, b):
        B, _, H, W = h.shape
        hr = h.reshape(B, 32, (C // 32) * H * W)
        mean = hr.mean(axis=2, keepdims=True)
        var = hr.var(axis=2, keepdims=True)
        hn = ((hr - mean) / jnp.sqrt(var + EPS)).reshape(B, C, H, W)
        hn = hn * w.reshape(1, C, 1, 1) + b.reshape(1, C, 1, 1)
        return hn * jax.nn.sigmoid(hn)

    w1 = p["w1"].astype(jnp.float32).reshape(3, 3, in_ch, out_ch)
    w2 = p["w2"].astype(jnp.float32).reshape(3, 3, out_ch, out_ch)

    h = gn_swish(x, in_ch, p["gn1_w"][0], p["gn1_b"][0])
    h = lax.conv_general_dilated(h, w1, (1, 1), "SAME", dimension_numbers=dn)
    h = h + p["b1"][0].reshape(1, -1, 1, 1)
    tp = (temb * jax.nn.sigmoid(temb)) @ p["wt"] + p["bt"]
    h = h + tp[:, :, None, None]
    h = gn_swish(h, out_ch, p["gn2_w"][0], p["gn2_b"][0])
    h = lax.conv_general_dilated(h, w2, (1, 1), "SAME", dimension_numbers=dn)
    h = h + p["b2"][0].reshape(1, -1, 1, 1)
    if in_ch != out_ch:
        sc = jnp.einsum("bchw,co->bohw", x, p["wsc"].astype(jnp.float32)) \
             + p["bsc"][0].reshape(1, -1, 1, 1)
    else:
        sc = x
    return h + sc


if __name__ == "__main__":
    key = jax.random.PRNGKey(0)

    # Case 1: Cin != Cout (1x1-conv shortcut).  GroupNorm(32, C) requires C % 32 == 0.
    B, in_ch, out_ch, tdim, H, W = 2, 32, 64, 128, 8, 8
    kx, kt, kp, kx2, kp2 = jax.random.split(key, 5)
    x = jax.random.normal(kx, (B, in_ch, H, W), jnp.float32)
    temb = jax.random.normal(kt, (B, tdim), jnp.float32)
    params = init_params(kp, in_ch, out_ch, tdim)

    out = jax.block_until_ready(res_block_pallas(x, temb, params))
    ref = ref_forward(x, temb, params, in_ch, out_ch)
    np.testing.assert_allclose(np.asarray(out), np.asarray(ref), atol=5e-2, rtol=5e-2)

    # Case 2: Cin == Cout (identity shortcut path).
    x2 = jax.random.normal(kx2, (B, in_ch, H, W), jnp.float32)
    params2 = init_params(kp2, in_ch, in_ch, tdim)
    out2 = jax.block_until_ready(res_block_pallas(x2, temb, params2))
    ref2 = ref_forward(x2, temb, params2, in_ch, in_ch)
    np.testing.assert_allclose(np.asarray(out2), np.asarray(ref2), atol=5e-2, rtol=5e-2)

    print("KERNEL_OK")
</pallas_src>

<mosaic_0001>
module attributes {stable_mosaic.version = 11 : i64} {
  func.func @kernel(%arg0: i32, %arg1: memref<1x64x32xbf16, #tpu.memory_space<vmem>>, %arg2: memref<1x1x64xf32, #tpu.memory_space<vmem>>, %arg3: memref<1x32xf32, #tpu.memory_space<vmem>>, %arg4: memref<1x32xf32, #tpu.memory_space<vmem>>, %arg5: memref<3x96x64xbf16, #tpu.memory_space<vmem>>, %arg6: memref<1x64xf32, #tpu.memory_space<vmem>>, %arg7: memref<1x64xf32, #tpu.memory_space<vmem>>, %arg8: memref<1x64xf32, #tpu.memory_space<vmem>>, %arg9: memref<3x192x64xbf16, #tpu.memory_space<vmem>>, %arg10: memref<1x64xf32, #tpu.memory_space<vmem>>, %arg11: memref<32x64xbf16, #tpu.memory_space<vmem>>, %arg12: memref<1x64xf32, #tpu.memory_space<vmem>>, %arg13: memref<1x64x64xbf16, #tpu.memory_space<vmem>>, %arg14: memref<80x96xbf16, #tpu.memory_space<vmem>>, %arg15: memref<80x192xbf16, #tpu.memory_space<vmem>>) attributes {dimension_semantics = [#tpu.dimension_semantics<parallel>], iteration_bounds = array<i64: 2>, scalar_prefetch = 0 : i64, scratch_operands = 2 : i64, tpu.core_type = #tpu.core_type<tc>, window_params = [{transform_indices = @transform_0, window_bounds = array<i64: 1, 64, 32>}, {transform_indices = @transform_1, window_bounds = array<i64: 1, 1, 64>}, {pipeline_mode = #tpu.pipeline_mode<synchronous>, transform_indices = @transform_2, window_bounds = array<i64: 1, 32>}, {pipeline_mode = #tpu.pipeline_mode<synchronous>, transform_indices = @transform_3, window_bounds = array<i64: 1, 32>}, {pipeline_mode = #tpu.pipeline_mode<synchronous>, transform_indices = @transform_4, window_bounds = array<i64: 3, 96, 64>}, {pipeline_mode = #tpu.pipeline_mode<synchronous>, transform_indices = @transform_5, window_bounds = array<i64: 1, 64>}, {pipeline_mode = #tpu.pipeline_mode<synchronous>, transform_indices = @transform_6, window_bounds = array<i64: 1, 64>}, {pipeline_mode = #tpu.pipeline_mode<synchronous>, transform_indices = @transform_7, window_bounds = array<i64: 1, 64>}, {pipeline_mode = #tpu.pipeline_mode<synchronous>, transform_indices = @transform_8, window_bounds = array<i64: 3, 192, 64>}, {pipeline_mode = #tpu.pipeline_mode<synchronous>, transform_indices = @transform_9, window_bounds = array<i64: 1, 64>}, {pipeline_mode = #tpu.pipeline_mode<synchronous>, transform_indices = @transform_10, window_bounds = array<i64: 32, 64>}, {pipeline_mode = #tpu.pipeline_mode<synchronous>, transform_indices = @transform_11, window_bounds = array<i64: 1, 64>}, {transform_indices = @transform_12, window_bounds = array<i64: 1, 64, 64>}]} {
    %c0 = arith.constant 0 : index
    %c0_0 = arith.constant 0 : index
    %c0_1 = arith.constant 0 : index
    %0 = vector.load %arg1[%c0, %c0_0, %c0_1] : memref<1x64x32xbf16, #tpu.memory_space<vmem>>, vector<1x64x32xbf16>
    %1 = vector.shape_cast %0 : vector<1x64x32xbf16> to vector<64x32xbf16>
    %2 = arith.extf %1 : vector<64x32xbf16> to vector<64x32xf32>
    %3 = tpu.iota {dimensions = array<i32: 0>} : vector<64x1xi32>
    %4 = arith.sitofp %3 : vector<64x1xi32> to vector<64x1xf32>
    %cst = arith.constant 8.000000e+00 : f32
    %5 = vector.broadcast %cst : f32 to vector<64x1xf32>
    %6 = arith.divf %4, %5 : vector<64x1xf32>
    %7 = math.floor %6 : vector<64x1xf32>
    %cst_2 = arith.constant 8.000000e+00 : f32
    %8 = vector.broadcast %cst_2 : f32 to vector<64x1xf32>
    %9 = arith.mulf %7, %8 : vector<64x1xf32>
    %10 = arith.subf %4, %9 : vector<64x1xf32>
    %cst_3 = arith.constant 5.000000e-01 : f32
    %11 = vector.broadcast %cst_3 : f32 to vector<64x1xf32>
    %12 = arith.cmpf ogt, %10, %11 : vector<64x1xf32>
    %cst_4 = arith.constant 1.000000e+00 : f32
    %cst_5 = arith.constant 0.000000e+00 : f32
    %13 = vector.broadcast %cst_4 : f32 to vector<64x1xf32>
    %14 = vector.broadcast %cst_5 : f32 to vector<64x1xf32>
    %15 = arith.select %12, %13, %14 : vector<64x1xi1>, vector<64x1xf32>
    %cst_6 = arith.constant 6.500000e+00 : f32
    %16 = vector.broadcast %cst_6 : f32 to vector<64x1xf32>
    %17 = arith.cmpf olt, %10, %16 : vector<64x1xf32>
    %cst_7 = arith.constant 1.000000e+00 : f32
    %cst_8 = arith.constant 0.000000e+00 : f32
    %18 = vector.broadcast %cst_7 : f32 to vector<64x1xf32>
    %19 = vector.broadcast %cst_8 : f32 to vector<64x1xf32>
    %20 = arith.select %17, %18, %19 : vector<64x1xi1>, vector<64x1xf32>
    %cst_9 = arith.constant 1.000000e+00 : f32
    %21 = vector.broadcast %cst_9 : f32 to vector<1x64xf32>
    %cst_10 = arith.constant dense<0.000000e+00> : vector<1x32xf32>
    %22 = tpu.matmul %21, %2, %cst_10 {dimension_numbers = #tpu.dot_dimension_numbers<[1], [0], [0], [1], [0, 0, 1, 1], [], []>} : vector<1x64xf32>, vector<64x32xf32>, vector<1x32xf32> -> vector<1x32xf32>
    %23 = arith.mulf %2, %2 : vector<64x32xf32>
    %cst_11 = arith.constant dense<0.000000e+00> : vector<1x32xf32>
    %24 = tpu.matmul %21, %23, %cst_11 {dimension_numbers = #tpu.dot_dimension_numbers<[1], [0], [0], [1], [0, 0, 1, 1], [], []>} : vector<1x64xf32>, vector<64x32xf32>, vector<1x32xf32> -> vector<1x32xf32>
    %25 = tpu.concatenate %22, %24 in 0 : vector<1x32xf32>, vector<1x32xf32> -> vector<2x32xf32>
    %26 = tpu.iota {dimensions = array<i32: 0>} : vector<32x32xi32>
    %27 = arith.sitofp %26 : vector<32x32xi32> to vector<32x32xf32>
    %cst_12 = arith.constant 1.000000e+00 : f32
    %28 = vector.broadcast %cst_12 : f32 to vector<32x32xf32>
    %29 = arith.divf %27, %28 : vector<32x32xf32>
    %30 = math.floor %29 : vector<32x32xf32>
    %31 = tpu.iota {dimensions = array<i32: 1>} : vector<32x32xi32>
    %32 = arith.sitofp %31 : vector<32x32xi32> to vector<32x32xf32>
    %cst_13 = arith.constant 1.000000e+00 : f32
    %33 = vector.broadcast %cst_13 : f32 to vector<32x32xf32>
    %34 = arith.divf %32, %33 : vector<32x32xf32>
    %35 = math.floor %34 : vector<32x32xf32>
    %36 = arith.cmpf oeq, %30, %35 : vector<32x32xf32>
    %cst_14 = arith.constant 1.000000e+00 : f32
    %cst_15 = arith.constant 0.000000e+00 : f32
    %37 = vector.broadcast %cst_14 : f32 to vector<32x32xf32>
    %38 = vector.broadcast %cst_15 : f32 to vector<32x32xf32>
    %39 = arith.select %36, %37, %38 : vector<32x32xi1>, vector<32x32xf32>
    %cst_16 = arith.constant dense<0.000000e+00> : vector<2x32xf32>
    %40 = tpu.matmul %25, %39, %cst_16 {dimension_numbers = #tpu.dot_dimension_numbers<[1], [0], [0], [1], [0, 0, 1, 1], [], []>} : vector<2x32xf32>, vector<32x32xf32>, vector<2x32xf32> -> vector<2x32xf32>
    %41 = vector.extract_strided_slice %40 {offsets = [0, 0], sizes = [1, 32], strides = [1, 1]} : vector<2x32xf32> to vector<1x32xf32>
    %cst_17 = arith.constant 1.562500e-02 : f32
    %42 = vector.broadcast %cst_17 : f32 to vector<1x32xf32>
    %43 = arith.mulf %41, %42 : vector<1x32xf32>
    %44 = vector.extract_strided_slice %40 {offsets = [1, 0], sizes = [1, 32], strides = [1, 1]} : vector<2x32xf32> to vector<1x32xf32>
    %cst_18 = arith.constant 1.562500e-02 : f32
    %45 = vector.broadcast %cst_18 : f32 to vector<1x32xf32>
    %46 = arith.mulf %44, %45 : vector<1x32xf32>
    %47 = arith.mulf %43, %43 : vector<1x32xf32>
    %48 = arith.subf %46, %47 : vector<1x32xf32>
    %cst_19 = arith.constant 0.000000e+00 : f32
    %49 = vector.broadcast %cst_19 : f32 to vector<1x32xf32>
    %50 = arith.maximumf %48, %49 : vector<1x32xf32>
    %cst_20 = arith.constant 9.99999974E-6 : f32
    %51 = vector.broadcast %cst_20 : f32 to vector<1x32xf32>
    %52 = arith.addf %50, %51 : vector<1x32xf32>
    %53 = math.rsqrt %52 : vector<1x32xf32>
    %c0_21 = arith.constant 0 : index
    %c0_22 = arith.constant 0 : index
    %54 = vector.load %arg3[%c0_21, %c0_22] : memref<1x32xf32, #tpu.memory_space<vmem>>, vector<1x32xf32>
    %55 = arith.mulf %53, %54 : vector<1x32xf32>
    %c0_23 = arith.constant 0 : index
    %c0_24 = arith.constant 0 : index
    %56 = vector.load %arg4[%c0_23, %c0_24] : memref<1x32xf32, #tpu.memory_space<vmem>>, vector<1x32xf32>
    %57 = arith.mulf %43, %55 : vector<1x32xf32>
    %58 = arith.subf %56, %57 : vector<1x32xf32>
    %59 = vector.broadcast %55 : vector<1x32xf32> to vector<64x32xf32>
    %60 = arith.mulf %2, %59 : vector<64x32xf32>
    %61 = vector.broadcast %58 : vector<1x32xf32> to vector<64x32xf32>
    %62 = arith.addf %60, %61 : vector<64x32xf32>
    %cst_25 = arith.constant 0.000000e+00 : f32
    %63 = vector.broadcast %cst_25 : f32 to vector<64x32xf32>
    %64 = arith.subf %63, %62 : vector<64x32xf32>
    %65 = math.exp %64 : vector<64x32xf32>
    %cst_26 = arith.constant 1.000000e+00 : f32
    %66 = vector.broadcast %cst_26 : f32 to vector<64x32xf32>
    %67 = arith.addf %66, %65 : vector<64x32xf32>
    %cst_27 = arith.constant 1.000000e+00 : f32
    %68 = vector.broadcast %cst_27 : f32 to vector<64x32xf32>
    %69 = arith.divf %68, %67 : vector<64x32xf32>
    %70 = arith.mulf %62, %69 : vector<64x32xf32>
    %71 = vector.broadcast %15 : vector<64x1xf32> to vector<64x32xf32>
    %72 = arith.mulf %70, %71 : vector<64x32xf32>
    %73 = vector.broadcast %20 : vector<64x1xf32> to vector<64x32xf32>
    %74 = arith.mulf %70, %73 : vector<64x32xf32>
    %c1_i32 = arith.constant 1 : i32
    %75 = tpu.dynamic_rotate %74 by %c1_i32 dim 0 : vector<64x32xf32>, i32 -> vector<64x32xf32>
    %c63_i32 = arith.constant 63 : i32
    %76 = tpu.dynamic_rotate %72 by %c63_i32 dim 0 : vector<64x32xf32>, i32 -> vector<64x32xf32>
    %77 = tpu.concatenate %75, %70, %76 in 1 : vector<64x32xf32>, vector<64x32xf32>, vector<64x32xf32> -> vector<64x96xf32>
    %78 = arith.truncf %77 : vector<64x96xf32> to vector<64x96xbf16>
    %cst_28 = arith.constant 0.000000e+00 : bf16
    %79 = vector.broadcast %cst_28 : bf16 to vector<8x96xbf16>
    %c0_29 = arith.constant 0 : index
    %c0_30 = arith.constant 0 : index
    %80 = vector.load %arg14[%c0_29, %c0_30] : memref<80x96xbf16, #tpu.memory_space<vmem>>, vector<8x96xbf16>
    tpu.vector_store %arg14[%c0_29, %c0_30], %79 {strides = array<i32>} : memref<80x96xbf16, #tpu.memory_space<vmem>>, vector<8x96xbf16>,
    %c72 = arith.constant 72 : index
    %c0_31 = arith.constant 0 : index
    %81 = vector.load %arg14[%c72, %c0_31] : memref<80x96xbf16, #tpu.memory_space<vmem>>, vector<8x96xbf16>
    tpu.vector_store %arg14[%c72, %c0_31], %79 {strides = array<i32>} : memref<80x96xbf16, #tpu.memory_space<vmem>>, vector<8x96xbf16>,
    %c8 = arith.constant 8 : index
    %c0_32 = arith.constant 0 : index
    %82 = vector.load %arg14[%c8, %c0_32] : memref<80x96xbf16, #tpu.memory_space<vmem>>, vector<64x96xbf16>
    tpu.vector_store %arg14[%c8, %c0_32], %78 {strides = array<i32>} : memref<80x96xbf16, #tpu.memory_space<vmem>>, vector<64x96xbf16>,
    %c0_33 = arith.constant 0 : index
    %c0_34 = arith.constant 0 : index
    %83 = vector.load %arg14[%c0_33, %c0_34] : memref<80x96xbf16, #tpu.memory_space<vmem>>, vector<64x96xbf16>
    %c0_35 = arith.constant 0 : index
    %c0_36 = arith.constant 0 : index
    %c0_37 = arith.constant 0 : index
    %84 = vector.load %arg5[%c0_35, %c0_36, %c0_37] : memref<3x96x64xbf16, #tpu.memory_space<vmem>>, vector<1x96x64xbf16>
    %85 = vector.shape_cast %84 : vector<1x96x64xbf16> to vector<96x64xbf16>
    %cst_38 = arith.constant dense<0.000000e+00> : vector<64x64xf32>
    %86 = tpu.matmul %83, %85, %cst_38 {dimension_numbers = #tpu.dot_dimension_numbers<[1], [0], [0], [1], [0, 0, 1, 1], [], []>} : vector<64x96xbf16>, vector<96x64xbf16>, vector<64x64xf32> -> vector<64x64xf32>
    %c8_39 = arith.constant 8 : index
    %c0_40 = arith.constant 0 : index
    %87 = vector.load %arg14[%c8_39, %c0_40] : memref<80x96xbf16, #tpu.memory_space<vmem>>, vector<64x96xbf16>
    %c1 = arith.constant 1 : index
    %c0_41 = arith.constant 0 : index
    %c0_42 = arith.constant 0 : index
    %88 = vector.load %arg5[%c1, %c0_41, %c0_42] : memref<3x96x64xbf16, #tpu.memory_space<vmem>>, vector<1x96x64xbf16>
    %89 = vector.shape_cast %88 : vector<1x96x64xbf16> to vector<96x64xbf16>
    %cst_43 = arith.constant dense<0.000000e+00> : vector<64x64xf32>
    %90 = tpu.matmul %87, %89, %cst_43 {dimension_numbers = #tpu.dot_dimension_numbers<[1], [0], [0], [1], [0, 0, 1, 1], [], []>} : vector<64x96xbf16>, vector<96x64xbf16>, vector<64x64xf32> -> vector<64x64xf32>
    %91 = arith.addf %86, %90 : vector<64x64xf32>
    %c16 = arith.constant 16 : index
    %c0_44 = arith.constant 0 : index
    %92 = vector.load %arg14[%c16, %c0_44] : memref<80x96xbf16, #tpu.memory_space<vmem>>, vector<64x96xbf16>
    %c2 = arith.constant 2 : index
    %c0_45 = arith.constant 0 : index
    %c0_46 = arith.constant 0 : index
    %93 = vector.load %arg5[%c2, %c0_45, %c0_46] : memref<3x96x64xbf16, #tpu.memory_space<vmem>>, vector<1x96x64xbf16>
    %94 = vector.shape_cast %93 : vector<1x96x64xbf16> to vector<96x64xbf16>
    %cst_47 = arith.constant dense<0.000000e+00> : vector<64x64xf32>
    %95 = tpu.matmul %92, %94, %cst_47 {dimension_numbers = #tpu.dot_dimension_numbers<[1], [0], [0], [1], [0, 0, 1, 1], [], []>} : vector<64x96xbf16>, vector<96x64xbf16>, vector<64x64xf32> -> vector<64x64xf32>
    %96 = arith.addf %91, %95 : vector<64x64xf32>
    %c0_48 = arith.constant 0 : index
    %c0_49 = arith.constant 0 : index
    %97 = vector.load %arg6[%c0_48, %c0_49] : memref<1x64xf32, #tpu.memory_space<vmem>>, vector<1x64xf32>
    %98 = vector.broadcast %97 : vector<1x64xf32> to vector<64x64xf32>
    %99 = arith.addf %96, %98 : vector<64x64xf32>
    %c0_50 = arith.constant 0 : index
    %c0_51 = arith.constant 0 : index
    %c0_52 = arith.constant 0 : index
    %100 = vector.load %arg2[%c0_50, %c0_51, %c0_52] : memref<1x1x64xf32, #tpu.memory_space<vmem>>, vector<1x1x64xf32>
    %101 = vector.shape_cast %100 : vector<1x1x64xf32> to vector<1x64xf32>
    %102 = vector.broadcast %101 : vector<1x64xf32> to vector<64x64xf32>
    %103 = arith.addf %99, %102 : vector<64x64xf32>
    %cst_53 = arith.constant dense<0.000000e+00> : vector<1x64xf32>
    %104 = tpu.matmul %21, %103, %cst_53 {dimension_numbers = #tpu.dot_dimension_numbers<[1], [0], [0], [1], [0, 0, 1, 1], [], []>} : vector<1x64xf32>, vector<64x64xf32>, vector<1x64xf32> -> vector<1x64xf32>
    %105 = arith.mulf %103, %103 : vector<64x64xf32>
    %cst_54 = arith.constant dense<0.000000e+00> : vector<1x64xf32>
    %106 = tpu.matmul %21, %105, %cst_54 {dimension_numbers = #tpu.dot_dimension_numbers<[1], [0], [0], [1], [0, 0, 1, 1], [], []>} : vector<1x64xf32>, vector<64x64xf32>, vector<1x64xf32> -> vector<1x64xf32>
    %107 = tpu.concatenate %104, %106 in 0 : vector<1x64xf32>, vector<1x64xf32> -> vector<2x64xf32>
    %108 = tpu.iota {dimensions = array<i32: 0>} : vector<64x64xi32>
    %109 = arith.sitofp %108 : vector<64x64xi32> to vector<64x64xf32>
    %cst_55 = arith.constant 2.000000e+00 : f32
    %110 = vector.broadcast %cst_55 : f32 to vector<64x64xf32>
    %111 = arith.divf %109, %110 : vector<64x64xf32>
    %112 = math.floor %111 : vector<64x64xf32>
    %113 = tpu.iota {dimensions = array<i32: 1>} : vector<64x64xi32>
    %114 = arith.sitofp %113 : vector<64x64xi32> to vector<64x64xf32>
    %cst_56 = arith.constant 2.000000e+00 : f32
    %115 = vector.broadcast %cst_56 : f32 to vector<64x64xf32>
    %116 = arith.divf %114, %115 : vector<64x64xf32>
    %117 = math.floor %116 : vector<64x64xf32>
    %118 = arith.cmpf oeq, %112, %117 : vector<64x64xf32>
    %cst_57 = arith.constant 1.000000e+00 : f32
    %cst_58 = arith.constant 0.000000e+00 : f32
    %119 = vector.broadcast %cst_57 : f32 to vector<64x64xf32>
    %120 = vector.broadcast %cst_58 : f32 to vector<64x64xf32>
    %121 = arith.select %118, %119, %120 : vector<64x64xi1>, vector<64x64xf32>
    %cst_59 = arith.constant dense<0.000000e+00> : vector<2x64xf32>
    %122 = tpu.matmul %107, %121, %cst_59 {dimension_numbers = #tpu.dot_dimension_numbers<[1], [0], [0], [1], [0, 0, 1, 1], [], []>} : vector<2x64xf32>, vector<64x64xf32>, vector<2x64xf32> -> vector<2x64xf32>
    %123 = vector.extract_strided_slice %122 {offsets = [0, 0], sizes = [1, 64], strides = [1, 1]} : vector<2x64xf32> to vector<1x64xf32>
    %cst_60 = arith.constant 7.812500e-03 : f32
    %124 = vector.broadcast %cst_60 : f32 to vector<1x64xf32>
    %125 = arith.mulf %123, %124 : vector<1x64xf32>
    %126 = vector.extract_strided_slice %122 {offsets = [1, 0], sizes = [1, 64], strides = [1, 1]} : vector<2x64xf32> to vector<1x64xf32>
    %cst_61 = arith.constant 7.812500e-03 : f32
    %127 = vector.broadcast %cst_61 : f32 to vector<1x64xf32>
    %128 = arith.mulf %126, %127 : vector<1x64xf32>
    %129 = arith.mulf %125, %125 : vector<1x64xf32>
    %130 = arith.subf %128, %129 : vector<1x64xf32>
    %cst_62 = arith.constant 0.000000e+00 : f32
    %131 = vector.broadcast %cst_62 : f32 to vector<1x64xf32>
    %132 = arith.maximumf %130, %131 : vector<1x64xf32>
    %cst_63 = arith.constant 9.99999974E-6 : f32
    %133 = vector.broadcast %cst_63 : f32 to vector<1x64xf32>
    %134 = arith.addf %132, %133 : vector<1x64xf32>
    %135 = math.rsqrt %134 : vector<1x64xf32>
    %c0_64 = arith.constant 0 : index
    %c0_65 = arith.constant 0 : index
    %136 = vector.load %arg7[%c0_64, %c0_65] : memref<1x64xf32, #tpu.memory_space<vmem>>, vector<1x64xf32>
    %137 = arith.mulf %135, %136 : vector<1x64xf32>
    %c0_66 = arith.constant 0 : index
    %c0_67 = arith.constant 0 : index
    %138 = vector.load %arg8[%c0_66, %c0_67] : memref<1x64xf32, #tpu.memory_space<vmem>>, vector<1x64xf32>
    %139 = arith.mulf %125, %137 : vector<1x64xf32>
    %140 = arith.subf %138, %139 : vector<1x64xf32>
    %141 = vector.broadcast %137 : vector<1x64xf32> to vector<64x64xf32>
    %142 = arith.mulf %103, %141 : vector<64x64xf32>
    %143 = vector.broadcast %140 : vector<1x64xf32> to vector<64x64xf32>
    %144 = arith.addf %142, %143 : vector<64x64xf32>
    %cst_68 = arith.constant 0.000000e+00 : f32
    %145 = vector.broadcast %cst_68 : f32 to vector<64x64xf32>
    %146 = arith.subf %145, %144 : vector<64x64xf32>
    %147 = math.exp %146 : vector<64x64xf32>
    %cst_69 = arith.constant 1.000000e+00 : f32
    %148 = vector.broadcast %cst_69 : f32 to vector<64x64xf32>
    %149 = arith.addf %148, %147 : vector<64x64xf32>
    %cst_70 = arith.constant 1.000000e+00 : f32
    %150 = vector.broadcast %cst_70 : f32 to vector<64x64xf32>
    %151 = arith.divf %150, %149 : vector<64x64xf32>
    %152 = arith.mulf %144, %151 : vector<64x64xf32>
    %153 = vector.broadcast %15 : vector<64x1xf32> to vector<64x64xf32>
    %154 = arith.mulf %152, %153 : vector<64x64xf32>
    %155 = vector.broadcast %20 : vector<64x1xf32> to vector<64x64xf32>
    %156 = arith.mulf %152, %155 : vector<64x64xf32>
    %c1_i32_71 = arith.constant 1 : i32
    %157 = tpu.dynamic_rotate %156 by %c1_i32_71 dim 0 : vector<64x64xf32>, i32 -> vector<64x64xf32>
    %c63_i32_72 = arith.constant 63 : i32
    %158 = tpu.dynamic_rotate %154 by %c63_i32_72 dim 0 : vector<64x64xf32>, i32 -> vector<64x64xf32>
    %159 = tpu.concatenate %157, %152, %158 in 1 : vector<64x64xf32>, vector<64x64xf32>, vector<64x64xf32> -> vector<64x192xf32>
    %160 = arith.truncf %159 : vector<64x192xf32> to vector<64x192xbf16>
    %cst_73 = arith.constant 0.000000e+00 : bf16
    %161 = vector.broadcast %cst_73 : bf16 to vector<8x192xbf16>
    %c0_74 = arith.constant 0 : index
    %c0_75 = arith.constant 0 : index
    %162 = vector.load %arg15[%c0_74, %c0_75] : memref<80x192xbf16, #tpu.memory_space<vmem>>, vector<8x192xbf16>
    tpu.vector_store %arg15[%c0_74, %c0_75], %161 {strides = array<i32>} : memref<80x192xbf16, #tpu.memory_space<vmem>>, vector<8x192xbf16>,
    %c72_76 = arith.constant 72 : index
    %c0_77 = arith.constant 0 : index
    %163 = vector.load %arg15[%c72_76, %c0_77] : memref<80x192xbf16, #tpu.memory_space<vmem>>, vector<8x192xbf16>
    tpu.vector_store %arg15[%c72_76, %c0_77], %161 {strides = array<i32>} : memref<80x192xbf16, #tpu.memory_space<vmem>>, vector<8x192xbf16>,
    %c8_78 = arith.constant 8 : index
    %c0_79 = arith.constant 0 : index
    %164 = vector.load %arg15[%c8_78, %c0_79] : memref<80x192xbf16, #tpu.memory_space<vmem>>, vector<64x192xbf16>
    tpu.vector_store %arg15[%c8_78, %c0_79], %160 {strides = array<i32>} : memref<80x192xbf16, #tpu.memory_space<vmem>>, vector<64x192xbf16>,
    %c0_80 = arith.constant 0 : index
    %c0_81 = arith.constant 0 : index
    %165 = vector.load %arg15[%c0_80, %c0_81] : memref<80x192xbf16, #tpu.memory_space<vmem>>, vector<64x192xbf16>
    %c0_82 = arith.constant 0 : index
    %c0_83 = arith.constant 0 : index
    %c0_84 = arith.constant 0 : index
    %166 = vector.load %arg9[%c0_82, %c0_83, %c0_84] : memref<3x192x64xbf16, #tpu.memory_space<vmem>>, vector<1x192x64xbf16>
    %167 = vector.shape_cast %166 : vector<1x192x64xbf16> to vector<192x64xbf16>
    %cst_85 = arith.constant dense<0.000000e+00> : vector<64x64xf32>
    %168 = tpu.matmul %165, %167, %cst_85 {dimension_numbers = #tpu.dot_dimension_numbers<[1], [0], [0], [1], [0, 0, 1, 1], [], []>} : vector<64x192xbf16>, vector<192x64xbf16>, vector<64x64xf32> -> vector<64x64xf32>
    %c8_86 = arith.constant 8 : index
    %c0_87 = arith.constant 0 : index
    %169 = vector.load %arg15[%c8_86, %c0_87] : memref<80x192xbf16, #tpu.memory_space<vmem>>, vector<64x192xbf16>
    %c1_88 = arith.constant 1 : index
    %c0_89 = arith.constant 0 : index
    %c0_90 = arith.constant 0 : index
    %170 = vector.load %arg9[%c1_88, %c0_89, %c0_90] : memref<3x192x64xbf16, #tpu.memory_space<vmem>>, vector<1x192x64xbf16>
    %171 = vector.shape_cast %170 : vector<1x192x64xbf16> to vector<192x64xbf16>
    %cst_91 = arith.constant dense<0.000000e+00> : vector<64x64xf32>
    %172 = tpu.matmul %169, %171, %cst_91 {dimension_numbers = #tpu.dot_dimension_numbers<[1], [0], [0], [1], [0, 0, 1, 1], [], []>} : vector<64x192xbf16>, vector<192x64xbf16>, vector<64x64xf32> -> vector<64x64xf32>
    %173 = arith.addf %168, %172 : vector<64x64xf32>
    %c16_92 = arith.constant 16 : index
    %c0_93 = arith.constant 0 : index
    %174 = vector.load %arg15[%c16_92, %c0_93] : memref<80x192xbf16, #tpu.memory_space<vmem>>, vector<64x192xbf16>
    %c2_94 = arith.constant 2 : index
    %c0_95 = arith.constant 0 : index
    %c0_96 = arith.constant 0 : index
    %175 = vector.load %arg9[%c2_94, %c0_95, %c0_96] : memref<3x192x64xbf16, #tpu.memory_space<vmem>>, vector<1x192x64xbf16>
    %176 = vector.shape_cast %175 : vector<1x192x64xbf16> to vector<192x64xbf16>
    %cst_97 = arith.constant dense<0.000000e+00> : vector<64x64xf32>
    %177 = tpu.matmul %174, %176, %cst_97 {dimension_numbers = #tpu.dot_dimension_numbers<[1], [0], [0], [1], [0, 0, 1, 1], [], []>} : vector<64x192xbf16>, vector<192x64xbf16>, vector<64x64xf32> -> vector<64x64xf32>
    %178 = arith.addf %173, %177 : vector<64x64xf32>
    %c0_98 = arith.constant 0 : index
    %c0_99 = arith.constant 0 : index
    %179 = vector.load %arg10[%c0_98, %c0_99] : memref<1x64xf32, #tpu.memory_space<vmem>>, vector<1x64xf32>
    %180 = vector.broadcast %179 : vector<1x64xf32> to vector<64x64xf32>
    %181 = arith.addf %178, %180 : vector<64x64xf32>
    %c0_100 = arith.constant 0 : index
    %c0_101 = arith.constant 0 : index
    %182 = vector.load %arg11[%c0_100, %c0_101] : memref<32x64xbf16, #tpu.memory_space<vmem>>, vector<32x64xbf16>
    %cst_102 = arith.constant dense<0.000000e+00> : vector<64x64xf32>
    %183 = tpu.matmul %1, %182, %cst_102 {dimension_numbers = #tpu.dot_dimension_numbers<[1], [0], [0], [1], [0, 0, 1, 1], [], []>} : vector<64x32xbf16>, vector<32x64xbf16>, vector<64x64xf32> -> vector<64x64xf32>
    %c0_103 = arith.constant 0 : index
    %c0_104 = arith.constant 0 : index
    %184 = vector.load %arg12[%c0_103, %c0_104] : memref<1x64xf32, #tpu.memory_space<vmem>>, vector<1x64xf32>
    %185 = vector.broadcast %184 : vector<1x64xf32> to vector<64x64xf32>
    %186 = arith.addf %183, %185 : vector<64x64xf32>
    %187 = arith.addf %181, %186 : vector<64x64xf32>
    %188 = arith.truncf %187 : vector<64x64xf32> to vector<64x64xbf16>
    %c0_105 = arith.constant 0 : index
    %c0_106 = arith.constant 0 : index
    %c0_107 = arith.constant 0 : index
    %189 = vector.load %arg13[%c0_105, %c0_106, %c0_107] : memref<1x64x64xbf16, #tpu.memory_space<vmem>>, vector<1x64x64xbf16>
    %190 = vector.shape_cast %189 : vector<1x64x64xbf16> to vector<64x64xbf16>
    %191 = vector.shape_cast %188 : vector<64x64xbf16> to vector<1x64x64xbf16>
    tpu.vector_store %arg13[%c0_105, %c0_106, %c0_107], %191 {strides = array<i32>} : memref<1x64x64xbf16, #tpu.memory_space<vmem>>, vector<1x64x64xbf16>,
    return
  }
  func.func @transform_0(%arg0: i32) -> (i32, i32, i32) {
    %c0_i32 = arith.constant 0 : i32
    %c0_i32_0 = arith.constant 0 : i32
    %c0_i32_1 = arith.constant 0 : i32
    return %arg0, %c0_i32, %c0_i32_0 : i32, i32, i32
  }
  func.func @transform_1(%arg0: i32) -> (i32, i32, i32) {
    %c0_i32 = arith.constant 0 : i32
    %c0_i32_0 = arith.constant 0 : i32
    %c0_i32_1 = arith.constant 0 : i32
    return %arg0, %c0_i32, %c0_i32_0 : i32, i32, i32
  }
  func.func @transform_2(%arg0: i32) -> (i32, i32) {
    %c0_i32 = arith.constant 0 : i32
    %c0_i32_0 = arith.constant 0 : i32
    %c0_i32_1 = arith.constant 0 : i32
    return %c0_i32, %c0_i32_0 : i32, i32
  }
  func.func @transform_3(%arg0: i32) -> (i32, i32) {
    %c0_i32 = arith.constant 0 : i32
    %c0_i32_0 = arith.constant 0 : i32
    %c0_i32_1 = arith.constant 0 : i32
    return %c0_i32, %c0_i32_0 : i32, i32
  }
  func.func @transform_4(%arg0: i32) -> (i32, i32, i32) {
    %c0_i32 = arith.constant 0 : i32
    %c0_i32_0 = arith.constant 0 : i32
    %c0_i32_1 = arith.constant 0 : i32
    %c0_i32_2 = arith.constant 0 : i32
    return %c0_i32, %c0_i32_0, %c0_i32_1 : i32, i32, i32
  }
  func.func @transform_5(%arg0: i32) -> (i32, i32) {
    %c0_i32 = arith.constant 0 : i32
    %c0_i32_0 = arith.constant 0 : i32
    %c0_i32_1 = arith.constant 0 : i32
    return %c0_i32, %c0_i32_0 : i32, i32
  }
  func.func @transform_6(%arg0: i32) -> (i32, i32) {
    %c0_i32 = arith.constant 0 : i32
    %c0_i32_0 = arith.constant 0 : i32
    %c0_i32_1 = arith.constant 0 : i32
    return %c0_i32, %c0_i32_0 : i32, i32
  }
  func.func @transform_7(%arg0: i32) -> (i32, i32) {
    %c0_i32 = arith.constant 0 : i32
    %c0_i32_0 = arith.constant 0 : i32
    %c0_i32_1 = arith.constant 0 : i32
    return %c0_i32, %c0_i32_0 : i32, i32
  }
  func.func @transform_8(%arg0: i32) -> (i32, i32, i32) {
    %c0_i32 = arith.constant 0 : i32
    %c0_i32_0 = arith.constant 0 : i32
    %c0_i32_1 = arith.constant 0 : i32
    %c0_i32_2 = arith.constant 0 : i32
    return %c0_i32, %c0_i32_0, %c0_i32_1 : i32, i32, i32
  }
  func.func @transform_9(%arg0: i32) -> (i32, i32) {
    %c0_i32 = arith.constant 0 : i32
    %c0_i32_0 = arith.constant 0 : i32
    %c0_i32_1 = arith.constant 0 : i32
    return %c0_i32, %c0_i32_0 : i32, i32
  }
  func.func @transform_10(%arg0: i32) -> (i32, i32) {
    %c0_i32 = arith.constant 0 : i32
    %c0_i32_0 = arith.constant 0 : i32
    %c0_i32_1 = arith.constant 0 : i32
    return %c0_i32, %c0_i32_0 : i32, i32
  }
  func.func @transform_11(%arg0: i32) -> (i32, i32) {
    %c0_i32 = arith.constant 0 : i32
    %c0_i32_0 = arith.constant 0 : i32
    %c0_i32_1 = arith.constant 0 : i32
    return %c0_i32, %c0_i32_0 : i32, i32
  }
  func.func @transform_12(%arg0: i32) -> (i32, i32, i32) {
    %c0_i32 = arith.constant 0 : i32
    %c0_i32_0 = arith.constant 0 : i32
    %c0_i32_1 = arith.constant 0 : i32
    return %arg0, %c0_i32, %c0_i32_0 : i32, i32, i32
  }
}

</mosaic_0001>

<bundles_post_ra>
// kernel: tpu_custom_call.1
= control target key start
LH: loop header
LB: loop body
LE: loop exit
PB: predicated region body
PF: predicated region fallthrough
CT: control target
= control target key end

     0   :  { %s4775_s0 = inlined_call_operand.vmem [shape: bf16[2,64,32], index: 0, kind: input, shape index: {}]   ;;  %s4776_s1 = inlined_call_operand.vmem [shape: f32[2,1,64], index: 1, kind: input, shape index: {}]   ;;  %s4777_s2 = inlined_call_operand.vmem [shape: f32[1,32], index: 2, kind: input, shape index: {}]   ;;  %s4778_s3 = inlined_call_operand.vmem [shape: f32[1,32], index: 3, kind: input, shape index: {}]   ;;  %s4779_s4 = inlined_call_operand.vmem [shape: bf16[3,96,64], index: 4, kind: input, shape index: {}]   ;;  %s4780_s5 = inlined_call_operand.vmem [shape: f32[1,64], index: 5, kind: input, shape index: {}]   ;;  %s4781_s6 = inlined_call_operand.vmem [shape: f32[1,64], index: 6, kind: input, shape index: {}]   ;;  %s4782_s7 = inlined_call_operand.vmem [shape: f32[1,64], index: 7, kind: input, shape index: {}]   ;;  %s4783_s8 = inlined_call_operand.vmem [shape: bf16[3,192,64], index: 8, kind: input, shape index: {}]   ;;  %s4784_s9 = inlined_call_operand.vmem [shape: f32[1,64], index: 9, kind: input, shape index: {}]   ;;  %s4785_s10 = inlined_call_operand.vmem [shape: bf16[32,64], index: 10, kind: input, shape index: {}]   ;;  %s4786_s11 = inlined_call_operand.vmem [shape: f32[1,64], index: 11, kind: input, shape index: {}]   ;;  %s4787_s12 = inlined_call_operand.hbm [shape: bf16[2,64,64], index: 12, kind: output, shape index: {}]  }
   0x1   :  { %4795 = sst [smem:[#allocation7_spill]] %s4775_s0 }
   0x2   :  { %4796 = sst [smem:[#allocation8_spill]] %s4776_s1 }
   0x3   :  { %17 = vsyncpa [#allocation5], 0 }
   0x4   :  { %19 = vsyncpa [#allocation5 + $0x1], 0  ;;  %s3751_s21 = smov 0   ;;  %s3753_s22 = smov 0  }
   0x5   :  { %s3755_s23 = smov 0   ;;  %s3757_s24 = smov 0  }
   0x6 LB: > { %s3772_s25 = sadd.s32 4294967295, %s3674_s24   ;;  %s2808_s26 = sadd.s32 4294967294, %s3674_s24   ;;  %s3674_s24 = sphi %s3757_s24, %s4813_s24   ;;  %s3670_s23 = sphi %s3755_s23, %s4812_s23   ;;  %s3666_s22 = sphi %s3753_s22, %s4811_s22   ;;  %s3662_s21 = sphi %s3751_s21, %s4810_s21  }
   0x7   : > { %s3776_s27 = sadd.s32 1, %s3674_s24   ;;  %s294_s28 = sadd.s32 1, %s3670_s23 }
   0x8   : > { %s291_s29 = ssub.s32 %s3674_s24, %s3776_s27  ;;  %p304_p0 = scmp.ne.s32.totalorder %s3670_s23, %s3666_s22 }
   0x9   : > { %p292_p1 = scmp.eq.s32.totalorder %s291_s29, 0  ;;  %p305_p2 = scmp.eq.s32.totalorder %s3772_s25, 1 }
   0xa   : > { %p310_p3 = scmp.ne.s32.totalorder %s3666_s22, %s3662_s21  ;;  %p311_p4 = scmp.eq.s32.totalorder %s2808_s26, 1 }
   0xb   : > { %s3787_s30 = scalar_select %p292_p1, %s3670_s23, %s294_s28  }
   0xc   : > { %p3789_p5 = por %p305_p2, %p304_p0  ;;  %p3793_p6 = por %p311_p4, %p310_p3 }
   0xd   : > { %p2811_p7 = scmp.ge.s32.totalorder %s3674_s24, 1  ;;  %p373_p8 = scmp.lt.s32.totalorder %s3674_s24, 3 }
   0xf   : > { %p374_p9 = pnand %p2811_p7, %p373_p8 }
  0x10   : > { %p418_p10 = scmp.lt.s32.totalorder (!%p374_p9), %s3772_s25, 1  ;;  %v3676_v0 = vmov (!%p374_p9), 0.0|0.0   ;;  %v443_v1 = vlaneseq (!%p374_p9)  ;;  %vm3677_vm0 = vmmov (!%p374_p9), 0   ;;  %v3678_v2 = vmov (!%p374_p9), 0.0   ;;  %s4799_s0 = sld [smem:[#allocation7_spill]] (!%p374_p9) }
  0x11   : > { %377 = sbr.rel (%p374_p9) target bundleno = 1932 (0x78c), region = 68  ;;  %3298 = vmatprep.subr.bf16.mxu1 (!%p374_p9), %v3676_v0  ;;  %3286 = vmatprep.subr.bf16.mxu0 (!%p374_p9), %v3676_v0  ;;  %vm525_vm1 = vcmask (!%p374_p9), 523264   ;;  %v3679_v38 = vmov (!%p374_p9), 1.0   ;;  %v4790_v39 = vmov (!%p374_p9), 1.0|1.0   ;;  %vm680_vm8 = vcmask (!%p374_p9), 1040384  }
  0x12   : > { %3143 = vmatprep.mubr.msk.f32.mxu1 (!%p374_p9), %vm3677_vm0, %v3678_v2  ;;  %3124 = vmatprep.mubr.msk.f32.mxu0 (!%p374_p9), %vm3677_vm0, %v3678_v2  ;;  %v3809_v3 = vshrl.u32 (!%p374_p9), %v443_v1, 7  ;;  %v3812_v4 = vand.u32 (!%p374_p9), 127, %v443_v1  ;;  %vm698_vm9 = vcmask (!%p374_p9), 261120   ;;  %v2822_v60 = vld [vmem:[%s4777_s2] ss:$0 sm:$0xff] (!%p374_p9)  ;;  %s3682_s18 = smov (!%p374_p9), 32  }
  0x13   : > { %s4793_s29 = smov (!%p374_p9), 64   ;;  %s4804_s1 = sld [smem:[#allocation8_spill]] (!%p374_p9) }
  0x14   : > { %v445_v8 = vadd.s32 (!%p374_p9), 8, %v3809_v3  ;;  %v3825_v9 = vcvt.s32.f32 (!%p374_p9), %v3809_v3  ;;  %v4792_v17 = vcvt.s32.f32 (!%p374_p9), %v3812_v4  ;;  %v446_v40 = vadd.s32 (!%p374_p9), 16, %v3809_v3 }
  0x15   : > { %v447_v41 = vadd.s32 (!%p374_p9), 24, %v3809_v3  ;;  %v448_v61 = vadd.s32 (!%p374_p9), 32, %v3809_v3  ;;  %v4789_v63 = vsub.s32 (!%p374_p9), 1, %v3809_v3  ;;  %v449_v1 = vadd.s32 (!%p374_p9), 40, %v3809_v3 }
  0x16   : > { %v3858_v23 = vcvt.s32.f32 (!%p374_p9), %v445_v8  ;;  %v682_v27 = vfloor.f32 (!%p374_p9), %v3825_v9  ;;  %v689_v31 = vfloor.f32 (!%p374_p9), %v4792_v17  ;;  %v3912_v42 = vcvt.s32.f32 (!%p374_p9), %v446_v40 }
  0x17   : > { %v3914_v43 = vcvt.s32.f32 (!%p374_p9), %v447_v41  ;;  %v461_v32 = vmul.f32 (!%p374_p9), 0.125, %v3825_v9  ;;  %v450_v33 = vadd.s32 (!%p374_p9), 48, %v3809_v3 }
  0x18   : > { %s3803_s15 = scalar_select %p418_p10, %s3772_s25, 1  ;;  %v683_v30 = vfloor.f32 %v3858_v23  ;;  %vm3877_vm2 = vcmp.eq.f32.partialorder %v682_v27, %v689_v31  ;;  %v684_v44 = vfloor.f32 %v3912_v42 }
  0x19   : > { %v685_v45 = vfloor.f32 %v3914_v43 }
  0x1a   : > { %s3012_s16 = sshll.u32 %s3803_s15, 5  ;;  %vm3881_vm3 = vcmp.eq.f32.partialorder %v683_v30, %v689_v31  ;;  %vm692_vm5 = vcmp.eq.f32.partialorder %v684_v44, %v689_v31 }
  0x1b   : > { %s422_s19 = scalar_lea.vmem %s4799_s0, %s3012_s16  ;;  %vm3311_vm4 = vmpackc.low %vm3881_vm3, %vm3877_vm2  ;;  %vm693_vm6 = vcmp.eq.f32.partialorder %v685_v45, %v689_v31  ;;  %s4809_s16 = smov 64  }
  0x1c   : > { %v3817_v5 = vld [vmem:[%s422_s19] sm:$0xff]   ;;  %v3819_v6 = vld [vmem:[%s422_s19 + $0x8] sm:$0xff]   ;;  %v3821_v7 = vld [vmem:[%s422_s19 + $0x10] sm:$0xff]  }
  0x1d   : > { %v3828_v10 = vunpack.c.l.bf16 %v3817_v5  ;;  %v3831_v11 = vunpack.c.h.bf16 %v3817_v5  ;;  %v3834_v12 = vunpack.c.l.bf16 %v3819_v6  ;;  %v3836_v13 = vld [vmem:[%s422_s19 + $0x18] sm:$0xff]   ;;  %v3839_v14 = vunpack.c.h.bf16 %v3819_v6  ;;  %3288 = vmatpush3.bf16.msra.mxu0 %v3817_v5  ;;  %vm3314_vm7 = vmpackc.low %vm693_vm6, %vm692_vm5 }
  0x1e   : > { %v3842_v15 = vunpack.c.l.bf16 %v3821_v7  ;;  %v3845_v16 = vunpack.c.h.bf16 %v3821_v7  ;;  %3289 = vmatprep.subr.bf16.mxu0 %v3676_v0  ;;  %v3865_v26 = vunpack.c.l.bf16 %v3836_v13  ;;  %v3870_v29 = vunpack.c.h.bf16 %v3836_v13 }
  0x1f   : > { %v599_v18 = vmul.f32 %v3828_v10, %v3828_v10  ;;  %v600_v19 = vmul.f32 %v3831_v11, %v3831_v11  ;;  %v601_v20 = vmul.f32 %v3834_v12, %v3834_v12  ;;  %v602_v21 = vmul.f32 %v3839_v14, %v3839_v14 }
  0x20   : > { %v603_v24 = vmul.f32 %v3842_v15, %v3842_v15  ;;  %v604_v25 = vmul.f32 %v3845_v16, %v3845_v16  ;;  %v605_v35 = vmul.f32 %v3865_v26, %v3865_v26  ;;  %v606_v36 = vmul.f32 %v3870_v29, %v3870_v29 }
  0x21   : > { %v3299_v22 = vpack.c.bf16 %v600_v19, %v599_v18  ;;  %v3302_v28 = vpack.c.bf16 %v602_v21, %v601_v20  ;;  %3291 = vmatpush3.bf16.msra.mxu0 %v3819_v6  ;;  %v3927_v19 = vcvt.s32.f32 %v448_v61  ;;  %v789_v20 = vld [vmem:[%s4778_s3] sm:$0x1] }
  0x22   : > { %3292 = vmatprep.subr.bf16.mxu0 %v3676_v0  ;;  %v3305_v34 = vpack.c.bf16 %v604_v25, %v603_v24  ;;  %v3308_v37 = vpack.c.bf16 %v606_v36, %v605_v35  ;;  %v4788_v25 = vsub.s32 0, %v3809_v3 }
  0x23   : > { %3300 = vmatpush3.bf16.msra.mxu1 %v3299_v22  ;;  %v3934_v22 = vcvt.s32.f32 %v449_v1 }
  0x24   : > { %3301 = vmatprep.subr.bf16.mxu1 %v3676_v0 }
  0x25   : > { %3294 = vmatpush3.bf16.msra.mxu0 %v3821_v7  ;;  %v466_v30 = vmul.f32 0.125, %v3934_v22 }
  0x26   : > { %3295 = vmatprep.subr.bf16.mxu0 %v3676_v0 }
  0x27   : > { %3303 = vmatpush3.bf16.msra.mxu1 %v3302_v28  ;;  %v465_v28 = vmul.f32 0.125, %v3927_v19 }
  0x28   : > { %3304 = vmatprep.subr.bf16.mxu1 %v3676_v0 }
  0x29   : > { %3297 = vmatpush3.bf16.msra.mxu0 %v3836_v13 }
  0x2a   : > { %3316 = vmatprep.subr.bf16.mxu0 %v3676_v0 }
  0x2b   : > { %3306 = vmatpush3.bf16.msra.mxu1 %v3305_v34 }
  0x2c   : > { %3307 = vmatprep.subr.bf16.mxu1 %v3676_v0  ;;  %3125 = vmatmul.mubr.msk.f32.vlgmr.msra.gmra.mrb[0].mxu0 %vm525_vm1, %v3679_v38 }
  0x2d   : > { %3233 = vmatprep.mubr.msk.f32.mxu0 %vm3677_vm0, %v3678_v2 }
  0x2f   : > { %3309 = vmatpush3.bf16.msra.mxu1 %v3308_v37 }
  0x30   : > { %3310 = vmatprep.subr.bf16.mxu1 %v3676_v0 }
  0x32   : > { %3144 = vmatmul.mubr.msk.f32.vlgmr.msra.gmra.mrb[0].mxu1 %vm525_vm1, %v3679_v38 }
  0x33   : > { %3312 = vmatpush3.bf16.msk.msra.mxu1 %vm3311_vm4, %v4790_v39  ;;  %3154 = vmatprep.mubr.msk.f32.mxu1 %vm3677_vm0, %v3678_v2 }
  0x34   : > { %3313 = vmatprep.subr.bf16.mxu1 %v3676_v0 }
  0x37   : > { %3315 = vmatpush3.bf16.msk.msra.mxu1 %vm3314_vm7, %v4790_v39 }
  0xff   : > { %v595_v46 = vpop.f32.mrb[0].mxu0 }
 0x100   : > { %v3126_v47 = vpop.f32.mrb[1].mxu0 }
 0x105   : > { %v673_v48 = vpop.f32.mrb[0].mxu1 }
 0x106   : > { %v678_v49 = vrot.slane %v673_v48, 7  ;;  %v3145_v50 = vpop.f32.mrb[1].mxu1 }
 0x108   : > { %v681_v51 = vsel %vm680_vm8, %v595_v46, %v678_v49 }
 0x109   : > { %3155 = vmatmul.mubr.msk.f32.vlgmr.msra.gmra.mrb[2].mxu1 %vm698_vm9, %v681_v51 }
 0x1dc   : > { %v768_v52 = vpop.f32.mrb[2].mxu1 }
 0x1dd   : > { %v772_v53 = vmul.f32 0.015625, %v768_v52  ;;  %v3156_v54 = vpop.f32.mrb[3].mxu1 }
 0x1de   : > { %v473_v54 = vfloor.f32 %v465_v28 }
 0x1df   : > { %v773_v55 = vmul.f32 %v772_v53, %v772_v53 }
 0x1e0   : > { %v481_v28 = vmul.f32 8.0, %v473_v54 }
 0x1e1   : > { %v775_v56 = vrot.slane %v773_v55, 7 }
 0x1e3   : > { %v777_v57 = vsub.f32 %v772_v53, %v775_v56 }
 0x1e5   : > { %v778_v58 = vmax.f32 %v777_v57, 0.0 }
 0x1e7   : > { %v779_v59 = vadd.f32 1e-05, %v778_v58  ;;  %v474_v58 = vfloor.f32 %v466_v30 }
 0x1e9   : > { %3544 = vrsqrt.f32 %v779_v59  ;;  %v462_v59 = vmul.f32 0.125, %v3858_v23 }
 0x1eb   : > { %v470_v30 = vfloor.f32 %v462_v59 }
 0x1f3   : > { %v3545_v62 = vpop.eup %3544 }
 0x1f4   : > { %v788_v8 = vmul.f32 %v3545_v62, %v2822_v60  ;;  %v469_v62 = vfloor.f32 %v461_v32 }
 0x1f6   : > { %v791_v18 = vrot.slane %v788_v8, 1  ;;  %v798_v21 = vrot.slane %v788_v8, %v4789_v63  ;;  %v3977_v8 = vcvt.s32.f32 %v450_v33 }
 0x1f8   : > { %v793_v24 = vmul.f32 %v791_v18, %v772_v53  ;;  %v803_v31 = vmul.f32 %v798_v21, %v3842_v15  ;;  %v804_v35 = vmul.f32 %v798_v21, %v3845_v16  ;;  %v799_v36 = vmul.f32 %v798_v21, %v3828_v10 }
 0x1f9   : > { %v800_v37 = vmul.f32 %v798_v21, %v3831_v11  ;;  %v801_v40 = vmul.f32 %v798_v21, %v3834_v12  ;;  %v802_v41 = vmul.f32 %v798_v21, %v3839_v14  ;;  %v805_v44 = vmul.f32 %v798_v21, %v3865_v26 }
 0x1fa   : > { %v794_v27 = vsub.f32 %v789_v20, %v793_v24  ;;  %v806_v15 = vmul.f32 %v798_v21, %v3870_v29  ;;  %v451_v53 = vadd.s32 56, %v3809_v3  ;;  %v463_v18 = vmul.f32 0.125, %v3912_v42 }
 0x1fb   : > { %v464_v20 = vmul.f32 0.125, %v3914_v43  ;;  %v467_v32 = vmul.f32 0.125, %v3977_v8 }
 0x1fc   : > { %v811_v34 = vrot.slane %v794_v27, %v4788_v25  ;;  %v3981_v27 = vcvt.s32.f32 %v451_v53  ;;  %v471_v33 = vfloor.f32 %v463_v18 }
 0x1fe   : > { %v3951_v45 = vadd.f32 %v811_v34, %v803_v31  ;;  %v3953_v46 = vadd.f32 %v811_v34, %v804_v35  ;;  %v3955_v47 = vadd.f32 %v811_v34, %v799_v36  ;;  %v3957_v48 = vadd.f32 %v811_v34, %v800_v37 }
 0x1ff   : > { %v3959_v16 = vadd.f32 %v811_v34, %v801_v40  ;;  %v3961_v10 = vadd.f32 %v811_v34, %v802_v41  ;;  %v3963_v11 = vadd.f32 %v811_v34, %v805_v44  ;;  %v3965_v12 = vadd.f32 %v811_v34, %v806_v15 }
 0x200   : > { %v825_v14 = vsub.f32 0.0, %v3951_v45  ;;  %v826_v26 = vsub.f32 0.0, %v3953_v46  ;;  %v821_v29 = vsub.f32 0.0, %v3955_v47  ;;  %v822_v49 = vsub.f32 0.0, %v3957_v48 }
 0x201   : > { %v823_v50 = vsub.f32 0.0, %v3959_v16  ;;  %v824_v51 = vsub.f32 0.0, %v3961_v10  ;;  %v827_v52 = vsub.f32 0.0, %v3963_v11  ;;  %v828_v61 = vsub.f32 0.0, %v3965_v12 }
 0x202   : > { %v837_v55 = vmul.f32 1.442695, %v825_v14  ;;  %v839_v56 = vmul.f32 1.442695, %v826_v26  ;;  %v829_v57 = vmul.f32 1.442695, %v821_v29  ;;  %v472_v36 = vfloor.f32 %v464_v20 }
 0x203   : > { %v831_v60 = vmul.f32 1.442695, %v822_v49  ;;  %v833_v1 = vmul.f32 1.442695, %v823_v50  ;;  %v835_v21 = vmul.f32 1.442695, %v824_v51  ;;  %v3986_v40 = vsub.f32 %v3927_v19, %v481_v28 }
 0x204   : > { %3546 = vpow2.f32 %v837_v55  ;;  %v841_v24 = vmul.f32 1.442695, %v827_v52  ;;  %v843_v31 = vmul.f32 1.442695, %v828_v61  ;;  %v482_v34 = vmul.f32 8.0, %v474_v58 }
 0x205   : > { %3548 = vpow2.f32 %v839_v56  ;;  %v477_v35 = vmul.f32 8.0, %v469_v62  ;;  %v468_v37 = vmul.f32 0.125, %v3981_v27  ;;  %v478_v41 = vmul.f32 8.0, %v470_v30 }
 0x206   : > { %3550 = vpow2.f32 %v829_v57  ;;  %v3989_v44 = vsub.f32 %v3934_v22, %v482_v34  ;;  %v475_v14 = vfloor.f32 %v467_v32  ;;  %v479_v26 = vmul.f32 8.0, %v471_v33 }
 0x207   : > { %3552 = vpow2.f32 %v831_v60  ;;  %v485_v15 = vsub.f32 %v3825_v9, %v477_v35  ;;  %v480_v29 = vmul.f32 8.0, %v472_v36  ;;  %v476_v50 = vfloor.f32 %v468_v37  ;;  %v3484_v37 = vld [vmem:[%s4779_s4 + $0x30] sm:$0xff]  }
 0x208   : > { %3554 = vpow2.f32 %v833_v1  ;;  %vm513_vm10 = vcmp.lt.f32.partialorder %v3986_v40, 6.5  ;;  %v486_v53 = vsub.f32 %v3858_v23, %v478_v41  ;;  %vm514_vm11 = vcmp.lt.f32.partialorder %v3989_v44, 6.5  ;;  %3157 = vmatprep.subr.bf16.mxu1 %v3484_v37 }
 0x209   : > { %3556 = vpow2.f32 %v835_v21  ;;  %vm509_vm12 = vcmp.lt.f32.partialorder %v485_v15, 6.5  ;;  %v483_v56 = vmul.f32 8.0, %v475_v14  ;;  %v487_v59 = vsub.f32 %v3912_v42, %v479_v26  ;;  %3158 = vmatpush3.bf16.msra.mxu1 %v3484_v37 }
 0x20a   : > { %3558 = vpow2.f32 %v841_v24  ;;  %v488_v60 = vsub.f32 %v3914_v43, %v480_v29  ;;  %v3998_v62 = vsel %vm513_vm10, 1.0, %v3678_v2  ;;  %v484_v18 = vmul.f32 8.0, %v476_v50 }
 0x20b   : > { %3560 = vpow2.f32 %v843_v31  ;;  %v4001_v21 = vsel %vm514_vm11, 1.0, %v3678_v2  ;;  %vm510_vm13 = vcmp.lt.f32.partialorder %v486_v53, 6.5  ;;  %v4005_v30 = vsel %vm509_vm12, 1.0, %v3678_v2 }
 0x20c   : > { %v4008_v34 = vsub.f32 %v3977_v8, %v483_v56  ;;  %vm511_vm14 = vcmp.lt.f32.partialorder %v487_v59, 6.5  ;;  %vm512_vm15 = vcmp.lt.f32.partialorder %v488_v60, 6.5  ;;  %vm493_vm2 = vcmp.gt.f32.partialorder %v485_v15, 0.5 }
 0x20d   : > { %v492_v33 = vsub.f32 %v3981_v27, %v484_v18  ;;  %vm494_vm3 = vcmp.gt.f32.partialorder %v486_v53, 0.5  ;;  %vm495_vm4 = vcmp.gt.f32.partialorder %v487_v59, 0.5  ;;  %vm496_vm5 = vcmp.gt.f32.partialorder %v488_v60, 0.5 }
 0x20e   : > { %v3547_v49 = vpop.eup %3546  ;;  %vm497_vm6 = vcmp.gt.f32.partialorder %v3986_v40, 0.5  ;;  %vm498_vm7 = vcmp.gt.f32.partialorder %v3989_v44, 0.5  ;;  %vm499_vm10 = vcmp.gt.f32.partialorder %v4008_v34, 0.5  ;;  %v4019_v41 = vsel %vm510_vm13, 1.0, %v3678_v2 }
 0x20f   : > { %v3549_v51 = vpop.eup %3548  ;;  %v849_v52 = vadd.f32 1.0, %v3547_v49  ;;  %v4023_v15 = vsel %vm511_vm14, 1.0, %v3678_v2  ;;  %v4027_v14 = vsel %vm512_vm15, 1.0, %v3678_v2  ;;  %v4030_v26 = vsel %vm493_vm2, 1.0, %v3678_v2 }
 0x210   : > { %v3551_v54 = vpop.eup %3550  ;;  %v850_v55 = vadd.f32 1.0, %v3549_v51  ;;  %v4033_v29 = vsel %vm494_vm3, 1.0, %v3678_v2  ;;  %v4036_v49 = vsel %vm495_vm4, 1.0, %v3678_v2  ;;  %vm516_vm11 = vcmp.lt.f32.partialorder %v492_v33, 6.5 }
 0x211   : > { %v3553_v57 = vpop.eup %3552  ;;  %3562 = vrcp.f32 %v849_v52  ;;  %v845_v58 = vadd.f32 1.0, %v3551_v54  ;;  %vm500_vm12 = vcmp.gt.f32.partialorder %v492_v33, 0.5  ;;  %v4040_v51 = vsel %vm496_vm5, 1.0, %v3678_v2 }
 0x212   : > { %v3555_v61 = vpop.eup %3554  ;;  %3564 = vrcp.f32 %v850_v55  ;;  %v846_v1 = vadd.f32 1.0, %v3553_v57  ;;  %v4045_v52 = vsel %vm497_vm6, 1.0, %v3678_v2  ;;  %v4050_v53 = vsel %vm498_vm7, 1.0, %v3678_v2 }
 0x213   : > { %v3557_v20 = vpop.eup %3556  ;;  %3566 = vrcp.f32 %v845_v58  ;;  %v847_v24 = vadd.f32 1.0, %v3555_v61  ;;  %v4055_v54 = vsel %vm499_vm10, 1.0, %v3678_v2  ;;  %vm918_vm13 = vcmp.lt.s32.totalorder %v3809_v3, 7 }
 0x214   : > { %v3559_v28 = vpop.eup %3558  ;;  %3568 = vrcp.f32 %v846_v1  ;;  %v848_v31 = vadd.f32 1.0, %v3557_v20  ;;  %vm1013_vm14 = vcmask 785412   ;;  %v4061_v58 = vsel %vm516_vm11, 1.0, %v3678_v2 }
 0x215   : > { %v3561_v35 = vpop.eup %3560  ;;  %3570 = vrcp.f32 %v847_v24  ;;  %v851_v32 = vadd.f32 1.0, %v3559_v28  ;;  %v4064_v44 = vsel %vm500_vm12, 1.0, %v3678_v2  ;;  %v3681_v59 = vmov 0  }
 0x216   : > { %3572 = vrcp.f32 %v848_v31  ;;  %v852_v36 = vadd.f32 1.0, %v3561_v35  ;;  %1014 = vst.msk [vmem:[#allocation2 + $0x20] sm:$0xf0] %vm1013_vm14, %v3681_v59  ;;  %1926 = vst [vmem:[#allocation3] sm:$0xf] %v3681_v59  ;;  %vm515_vm15 = vcmp.lt.f32.partialorder %v4008_v34, 6.5 }
 0x217   : > { %3574 = vrcp.f32 %v851_v32  ;;  %1929 = vst [vmem:[#allocation3 + $0x40] sm:$0xf0] %v3681_v59  ;;  %vm901_vm2 = vcmp.lt.s32.totalorder %v3809_v3, 1  ;;  %vm1011_vm3 = vcmask 781312   ;;  %vm1019_vm4 = vcmask 1043456  }
 0x218   : > { %3576 = vrcp.f32 %v852_v36  ;;  %1012 = vst.msk [vmem:[#allocation2] sm:$0xf] %vm1011_vm3, %v3681_v59  ;;  %vm1033_vm5 = vcmask 785408  }
 0x21b   : > { %v3563_v50 = vpop.eup %3562 }
 0x21c   : > { %v3565_v55 = vpop.eup %3564  ;;  %v873_v56 = vmul.f32 %v3563_v50, %v3951_v45 }
 0x21d   : > { %v3567_v40 = vpop.eup %3566  ;;  %v874_v57 = vmul.f32 %v3565_v55, %v3953_v46 }
 0x21e   : > { %v3569_v45 = vpop.eup %3568  ;;  %v889_v60 = vmul.f32 %v873_v56, %v3998_v62  ;;  %v869_v46 = vmul.f32 %v3567_v40, %v3955_v47  ;;  %v881_v61 = vmul.f32 %v873_v56, %v4045_v52 }
 0x21f   : > { %v3571_v1 = vpop.eup %3570  ;;  %v4076_v18 = vmul.f32 %v874_v57, %v4001_v21  ;;  %v3430_v20 = vpack.i.bf16 %v874_v57, %v873_v56  ;;  %v870_v24 = vmul.f32 %v3569_v45, %v3957_v48  ;;  %v882_v28 = vmul.f32 %v874_v57, %v4050_v53 }
 0x220   : > { %v3573_v31 = vpop.eup %3572  ;;  %v897_v35 = vrot.slane %v889_v60, 7  ;;  %v885_v32 = vmul.f32 %v869_v46, %v4005_v30  ;;  %v871_v33 = vmul.f32 %v3571_v1, %v3959_v16  ;;  %v4083_v47 = vmul.f32 %v869_v46, %v4030_v26 }
 0x221   : > { %v3575_v36 = vpop.eup %3574  ;;  %v898_v37 = vrot.slane %v4076_v18, 7  ;;  %3431 = vrot.lane.b32.xlu1 %v3430_v20, %s3682_s18  ;;  %v886_v50 = vmul.f32 %v870_v24, %v4019_v41  ;;  %v3420_v48 = vpack.i.bf16 %v870_v24, %v869_v46  ;;  %v872_v55 = vmul.f32 %v3573_v31, %v3961_v10  ;;  %v3485_v10 = vld [vmem:[%s4779_s4 + $0x38] sm:$0xff]  }
 0x222   : > { %v3577_v56 = vpop.eup %3576  ;;  %v893_v40 = vrot.slane %v885_v32, 7  ;;  %v887_v57 = vmul.f32 %v871_v33, %v4023_v15  ;;  %v878_v16 = vmul.f32 %v870_v24, %v4033_v29  ;;  %v879_v45 = vmul.f32 %v871_v33, %v4036_v49  ;;  %3159 = vmatprep.subr.bf16.mxu1 %v3485_v10 }
 0x223   : > { %v894_v60 = vrot.slane %v886_v50, 7  ;;  %3421 = vrot.lane.b32.xlu0 %v3420_v48, %s3682_s18  ;;  %v888_v1 = vmul.f32 %v872_v55, %v4027_v14  ;;  %v3425_v25 = vpack.i.bf16 %v872_v55, %v871_v33  ;;  %v910_v20 = vrot.slane %v4083_v47, 1  ;;  %3160 = vmatpush3.bf16.msra.mxu1 %v3485_v10 }
 0x224   : > { %v911_v46 = vrot.slane %v878_v16, 1  ;;  %v912_v31 = vrot.slane %v879_v45, 1  ;;  %v880_v32 = vmul.f32 %v872_v55, %v4040_v51  ;;  %v914_v63 = vrot.slane %v881_v61, 1 }
 0x225   : > { %v875_v24 = vmul.f32 %v3575_v36, %v3963_v11  ;;  %v915_v39 = vrot.slane %v882_v28, 1  ;;  %v876_v50 = vmul.f32 %v3577_v56, %v3965_v12  ;;  %v896_v48 = vrot.slane %v888_v1, 7  ;;  %v3486_v28 = vld [vmem:[%s4779_s4 + $0x40] sm:$0xff]  }
 0x226   : > { %v924_v33 = vsel %vm918_vm13, %v911_v46, %v912_v31  ;;  %v925_v47 = vsel %vm918_vm13, %v910_v20, %v911_v46  ;;  %v913_v17 = vrot.slane %v880_v32, 1  ;;  %v4109_v55 = vsel %vm901_vm2, %v897_v35, %v898_v37  ;;  %3161 = vmatprep.subr.bf16.mxu1 %v3486_v28 }
 0x227   : > { %3426 = vrot.lane.b32.xlu0 %v3425_v25, %s3682_s18  ;;  %v3435_v11 = vpack.i.bf16 %v924_v33, %v925_v47  ;;  %v883_v12 = vmul.f32 %v875_v24, %v4055_v54  ;;  %v892_v61 = vmul.f32 %v876_v50, %v4061_v58  ;;  %v4120_v36 = vsel %vm515_vm15, 1.0, %v3678_v2  ;;  %3162 = vmatpush3.bf16.msra.mxu1 %v3486_v28 }
 0x228   : > { %v922_v56 = vsel %vm918_vm13, %v913_v17, %v914_v63  ;;  %v923_v25 = vsel %vm918_vm13, %v912_v31, %v913_v17  ;;  %v921_v16 = vsel %vm918_vm13, %v914_v63, %v915_v39  ;;  %v884_v45 = vmul.f32 %v876_v50, %v4064_v44 }
 0x229   : > { %3436 = vrot.lane.b32.xlu1 %v3435_v11, %s4793_s29  ;;  %v3440_v1 = vpack.i.bf16 %v922_v56, %v923_v25  ;;  %v916_v10 = vrot.slane %v883_v12, 1  ;;  %v4132_v34 = vsel %vm901_vm2, %v896_v48, %v897_v35  ;;  %v900_v46 = vrot.slane %v892_v61, 7  ;;  %v4173_v56 = vld [vmem:[%s4779_s4] sm:$0xff]  }
 0x22a   : > { %v917_v32 = vrot.slane %v884_v45, 1  ;;  %v908_v17 = vsel %vm901_vm2, %v893_v40, %v894_v60  ;;  %v895_v31 = vrot.slane %v887_v57, 7  ;;  %v891_v47 = vmul.f32 %v875_v24, %v4120_v36 }
 0x22b   : > { %3441 = vrot.lane.b32.xlu0 %v3440_v1, %s4793_s29  ;;  %v920_v63 = vsel %vm918_vm13, %v915_v39, %v916_v10  ;;  %v909_v33 = vsel %vm901_vm2, %v900_v46, %v893_v40  ;;  %v3450_v11 = vpack.i.bf16 %v876_v50, %v875_v24  ;;  %v3487_v40 = vld [vmem:[%s4779_s4 + $0x48] sm:$0xff]   ;;  %v3488_v24 = vld [vmem:[%s4779_s4 + $0x50] sm:$0xff]  }
 0x22c   : > { %v3445_v35 = vpack.i.bf16 %v920_v63, %v921_v16  ;;  %v919_v12 = vsel %vm918_vm13, %v916_v10, %v917_v32  ;;  %v906_v61 = vsel %vm901_vm2, %v895_v31, %v896_v48  ;;  %v926_v57 = vsel %vm918_vm13, %v917_v32, %v910_v20  ;;  %3163 = vmatprep.subr.bf16.mxu1 %v3487_v40  ;;  %v3489_v48 = vld [vmem:[%s4779_s4 + $0x58] sm:$0xff]  }
 0x22d   : > { %v907_v28 = vsel %vm901_vm2, %v894_v60, %v895_v31  ;;  %v899_v39 = vrot.slane %v891_v47, 7  ;;  %v3455_v50 = vpack.i.bf16 %v926_v57, %v919_v12  ;;  %3164 = vmatpush3.bf16.msra.mxu1 %v3487_v40 }
 0x22e   : > { %3446 = vrot.lane.b32.xlu1 %v3445_v35, %s4793_s29  ;;  %3165 = vmatprep.subr.bf16.mxu1 %v3488_v24 }
 0x22f   : > { %3451 = vrot.lane.b32.xlu0 %v3450_v11, %s3682_s18  ;;  %v902_v60 = vsel %vm901_vm2, %v899_v39, %v900_v46  ;;  %v903_v20 = vsel %vm901_vm2, %v898_v37, %v899_v39  ;;  %s3021_s18 = sshll.u32 %s3772_s25, 9 }
 0x231   : > { %3166 = vmatpush3.bf16.msra.mxu1 %v3488_v24 }
 0x232   : > { %3456 = vrot.lane.b32.xlu1 %v3455_v50, %s4793_s29  ;;  %3167 = vmatprep.subr.bf16.mxu1 %v3489_v48  ;;  %s425_s29 = scalar_lea.vmem %s4804_s1, %s3803_s15  ;;  %s415_s15 = sand.u32 1, %s3666_s22  }
 0x233   : > { %s2812_s26 = sshll.u32 %s415_s15, 5  ;;  %s4732_s25 = scalar_lea.sflag [#allocation5], %s415_s15 }
 0x234   : > { %s4699_s28 = scalar_lea.vmem [#allocation4], %s2812_s26 }
 0x235   : > { %3168 = vmatpush3.bf16.msra.mxu1 %v3489_v48  ;;  %s2737_s17 = sshll.u32 %s4699_s28, 4  ;;  %s4726_s17 = int_to_ptr.vmem [resolvable:$true] %s2737_s17 }
 0x236   : > { %3177 = vmatprep.subr.bf16.mxu1 %v4173_v56  ;;  %s3612_s26 = scalar_lea.vmem %s4726_s17, 512 }
 0x237   : > { %p3613_p11 = scmp.ne.s32.totalorder %s4726_s17, %s3612_s26 }
 0x239   : > { %p3614_p12 = pnand %p3613_p11, %p3789_p5 }
 0x23b   : > { %p3615_p13 = pneg %p3614_p12 }
 0x293   : > { %v3432_v18 = vpop.permute.xlu1 %3431 }
 0x294   : > { %v3434_v63 = vunpack.i.h.bf16 %v3432_v18  ;;  %v3433_v47 = vunpack.i.l.bf16 %v3432_v18 }
 0x295   : > { %v3422_v37 = vpop.permute.xlu0 %3421 }
 0x296   : > { %v3424_v25 = vunpack.i.h.bf16 %v3422_v37  ;;  %v3423_v16 = vunpack.i.l.bf16 %v3422_v37 }
 0x298   : > { %v991_v35 = vsel %vm698_vm9, %v909_v33, %v3423_v16  ;;  %v992_v11 = vsel %vm698_vm9, %v908_v17, %v3424_v25 }
 0x299   : > { %v3427_v45 = vpop.permute.xlu0 %3426 }
 0x29a   : > { %v3429_v1 = vunpack.i.h.bf16 %v3427_v45  ;;  %v3428_v10 = vunpack.i.l.bf16 %v3427_v45 }
 0x29b   : > { %v3437_v46 = vpop.permute.xlu1 %3436 }
 0x29c   : > { %v3439_v32 = vunpack.i.h.bf16 %v3437_v46  ;;  %v3438_v31 = vunpack.i.l.bf16 %v3437_v46  ;;  %v994_v50 = vsel %vm698_vm9, %v906_v61, %v3429_v1  ;;  %v993_v48 = vsel %vm698_vm9, %v907_v28, %v3428_v10 }
 0x29d   : > { %v3442_v12 = vpop.permute.xlu0 %3441  ;;  %v996_v61 = vsel %vm698_vm9, %v4109_v55, %v3434_v63 }
 0x29e   : > { %v1000_v57 = vsel %vm525_vm1, %v992_v11, %v3439_v32  ;;  %v999_v39 = vsel %vm525_vm1, %v991_v35, %v3438_v31  ;;  %v3444_v40 = vunpack.i.h.bf16 %v3442_v12  ;;  %v3443_v24 = vunpack.i.l.bf16 %v3442_v12 }
 0x29f   : > { %v1007_v37 = vpack.c.bf16 %v1000_v57, %v999_v39  ;;  %v995_v31 = vsel %vm698_vm9, %v4132_v34, %v3433_v47 }
 0x2a0   : > { %v1001_v45 = vsel %vm525_vm1, %v993_v48, %v3443_v24  ;;  %v1002_v18 = vsel %vm525_vm1, %v994_v50, %v3444_v40  ;;  %v3447_v33 = vpop.permute.xlu1 %3446 }
 0x2a1   : > { %v1020_v16 = vrot.slane %v1007_v37, 4  ;;  %v1008_v17 = vpack.c.bf16 %v1002_v18, %v1001_v45  ;;  %v3449_v25 = vunpack.i.h.bf16 %v3447_v33  ;;  %v3448_v46 = vunpack.i.l.bf16 %v3447_v33  ;;  %v3452_v32 = vpop.permute.xlu0 %3451 }
 0x2a2   : > { %v3454_v1 = vunpack.i.h.bf16 %v3452_v32  ;;  %v3453_v28 = vunpack.i.l.bf16 %v3452_v32  ;;  %v3491_v32 = vld [vmem:[%s4779_s4 + $0x8] sm:$0xff]  }
 0x2a3   : > { %1032 = vst.msk [vmem:[#allocation2] sm:$0xf0] %vm1013_vm14, %v1020_v16  ;;  %v1021_v10 = vrot.slane %v1008_v17, 4  ;;  %v1004_v35 = vsel %vm525_vm1, %v996_v61, %v3449_v25  ;;  %v1003_v11 = vsel %vm525_vm1, %v995_v31, %v3448_v46 }
 0x2a4   : > { %v1009_v12 = vpack.c.bf16 %v1004_v35, %v1003_v11  ;;  %v998_v57 = vsel %vm698_vm9, %v902_v60, %v3454_v1  ;;  %v997_v39 = vsel %vm698_vm9, %v903_v20, %v3453_v28  ;;  %v3457_v40 = vpop.permute.xlu1 %3456 }
 0x2a5   : > { %v1022_v34 = vsel %vm1019_vm4, %v1020_v16, %v1021_v10  ;;  %v3459_v47 = vunpack.i.h.bf16 %v3457_v40  ;;  %v3458_v55 = vunpack.i.l.bf16 %v3457_v40  ;;  %v3495_v40 = vld [vmem:[%s4779_s4 + $0x28] sm:$0xff]  }
 0x2a6   : > { %1034 = vst.msk [vmem:[#allocation2 + $0x8] sm:$0xff] %vm1033_vm5, %v1022_v34  ;;  %v1023_v63 = vrot.slane %v1009_v12, 4  ;;  %v3493_v12 = vld [vmem:[%s4779_s4 + $0x18] sm:$0xff]   ;;  %v3496_v34 = vld [vmem:[%s4779_s4 + $0x60] sm:$0xff]  }
 0x2a7   : > { %v1006_v24 = vsel %vm525_vm1, %v998_v57, %v3459_v47  ;;  %v1005_v50 = vsel %vm525_vm1, %v997_v39, %v3458_v55  ;;  %v3494_v39 = vld [vmem:[%s4779_s4 + $0x20] sm:$0xff]   ;;  %v3497_v47 = vld [vmem:[%s4779_s4 + $0x68] sm:$0xff]   ;;  %v3498_v55 = vld [vmem:[%s4779_s4 + $0x70] sm:$0xff]  }
 0x2a8   : > { %v1024_v48 = vsel %vm1019_vm4, %v1021_v10, %v1023_v63  ;;  %v1010_v37 = vpack.c.bf16 %v1006_v24, %v1005_v50  ;;  %v3492_v10 = vld [vmem:[%s4779_s4 + $0x10] sm:$0xff]   ;;  %v3500_v24 = vld [vmem:[%s4779_s4 + $0x80] sm:$0xff]   ;;  %v3501_v50 = vld [vmem:[%s4779_s4 + $0x88] sm:$0xff]  }
 0x2a9   : > { %1035 = vst.msk [vmem:[#allocation2 + $0x10] sm:$0xff] %vm1033_vm5, %v1024_v48 }
 0x2aa   : > { %v1025_v60 = vrot.slane %v1010_v37, 4  ;;  %v1054_v45 = vld [vmem:[#allocation2] sm:$0xf0]  ;;  %v2877_v37 = vld [vmem:[%s4780_s5] ss:$0 sm:$0xff] }
 0x2ab   : > { %v1074_v33 = vrot.slane %v1054_v45, 4 }
 0x2ac   : > { %v1026_v20 = vsel %vm1019_vm4, %v1023_v63, %v1025_v60  ;;  %1037 = vst.msk [vmem:[#allocation2 + $0x20] sm:$0xf] %vm1011_vm3, %v1025_v60  ;;  %v3499_v63 = vld [vmem:[%s4779_s4 + $0x78] sm:$0xff]  }
 0x2ad   : > { %1036 = vst.msk [vmem:[#allocation2 + $0x18] sm:$0xff] %vm1033_vm5, %v1026_v20  ;;  %v1039_v18 = vld [vmem:[#allocation2 + $0x8] sm:$0xff] }
 0x2ae   : > { %v1075_v16 = vrot.slane %v1039_v18, 4 }
 0x2b0   : > { %v1076_v17 = vsel %vm1019_vm4, %v1074_v33, %v1075_v16  ;;  %v1040_v25 = vld [vmem:[#allocation2 + $0x10] sm:$0xff]  ;;  %v2878_v33 = vld [vmem:[%s425_s29] ss:$0 sm:$0xff]  ;;  %s4722_s29 = scalar_lea.hbm %s4787_s12, %s3021_s18  ;;  %s3684_s18 = smov [#allocation4]  }
 0x2b1   : > { %3169 = vmatprep.mubr.msk.bf16.mxu1 %vm1033_vm5, %v1076_v17  ;;  %v1077_v46 = vrot.slane %v1040_v25, 4  ;;  %s3616_s19 = sshll.u32 %s3684_s18, 4  ;;  %s3617_s19 = int_to_ptr.vmem [resolvable:$false] %s3616_s19 }
 0x2b2   : > { %s3618_s20 = scalar_lea.vmem %s3617_s19, 1024  ;;  %p3619_p0 = scmp.lt.s32.totalorder %s4726_s17, %s3617_s19 }
 0x2b3   : > { %v1078_v31 = vsel %vm1019_vm4, %v1075_v16, %v1077_v46  ;;  %v1055_v1 = vld [vmem:[#allocation2 + $0x20] sm:$0xf]  ;;  %p3620_p1 = scmp.lt.s32.totalorder %s3618_s20, %s3612_s26 }
 0x2b4   : > { %3170 = vmatmul.mubr.msk.bf16.vlgmr.msra.gmra.mrb[4].mxu1 %vm1033_vm5, %v1078_v31  ;;  %v1041_v61 = vld [vmem:[#allocation2 + $0x18] sm:$0xff]  ;;  %v1081_v11 = vrot.slane %v1055_v1, 4  ;;  %v1309_v48 = vld [vmem:[#allocation2 + $0x20] sm:$0xff] }
 0x2b5   : > { %3178 = vmatpush3.bf16.msra.mxu1 %v4173_v56  ;;  %v1079_v28 = vrot.slane %v1041_v61, 4  ;;  %v1038_v56 = vld [vmem:[#allocation2] sm:$0xff]  ;;  %p3621_p2 = por %p3620_p1, %p3619_p0 }
 0x2b6   : > { %3179 = vmatprep.subr.bf16.mxu1 %v3491_v32 }
 0x2b7   : > { %v1080_v35 = vsel %vm1019_vm4, %v1077_v46, %v1079_v28  ;;  %v1082_v57 = vsel %vm1019_vm4, %v1079_v28, %v1081_v11  ;;  %p3622_p3 = pnand %p3621_p2, %p3615_p13 }
 0x2b8   : > { %3173 = vmatprep.mubr.msk.bf16.mxu1 %vm1033_vm5, %v1080_v35 }
 0x2b9   : > { %3180 = vmatpush3.bf16.msra.mxu1 %v3491_v32 }
 0x2ba   : > { %3181 = vmatprep.subr.bf16.mxu1 %v3492_v10 }
 0x2bc   : > { %3174 = vmatmul.mubr.msk.bf16.gmra.mrb[8].mxu1 %vm1033_vm5, %v1082_v57 }
 0x2bd   : > { %3182 = vmatpush3.bf16.msra.mxu1 %v3492_v10  ;;  %3189 = vmatprep.mubr.msk.bf16.mxu1 %vm1033_vm5, %v1038_v56 }
 0x2be   : > { %3183 = vmatprep.subr.bf16.mxu1 %v3493_v12 }
 0x2c1   : > { %3184 = vmatpush3.bf16.msra.mxu1 %v3493_v12 }
 0x2c2   : > { %3185 = vmatprep.subr.bf16.mxu1 %v3494_v39 }
 0x2c5   : > { %3186 = vmatpush3.bf16.msra.mxu1 %v3494_v39 }
 0x2c6   : > { %3187 = vmatprep.subr.bf16.mxu1 %v3495_v40 }
 0x2c9   : > { %3188 = vmatpush3.bf16.msra.mxu1 %v3495_v40 }
 0x2ca   : > { %3197 = vmatprep.subr.bf16.mxu1 %v3496_v34 }
 0x2cc   : > { %3190 = vmatmul.mubr.msk.bf16.vlgmr.msra.gmra.mrb[4].mxu1 %vm1033_vm5, %v1039_v18 }
 0x2cd   : > { %3193 = vmatprep.mubr.msk.bf16.mxu1 %vm1033_vm5, %v1040_v25  ;;  %3198 = vmatpush3.bf16.msra.mxu1 %v3496_v34 }
 0x2ce   : > { %3199 = vmatprep.subr.bf16.mxu1 %v3497_v47 }
 0x2d1   : > { %3200 = vmatpush3.bf16.msra.mxu1 %v3497_v47 }
 0x2d2   : > { %3201 = vmatprep.subr.bf16.mxu1 %v3498_v55 }
 0x2d4   : > { %3194 = vmatmul.mubr.msk.bf16.gmra.mrb[8].mxu1 %vm1033_vm5, %v1041_v61 }
 0x2d5   : > { %3202 = vmatpush3.bf16.msra.mxu1 %v3498_v55  ;;  %3209 = vmatprep.mubr.msk.bf16.mxu1 %vm1033_vm5, %v1039_v18 }
 0x2d6   : > { %3203 = vmatprep.subr.bf16.mxu1 %v3499_v63 }
 0x2d9   : > { %3204 = vmatpush3.bf16.msra.mxu1 %v3499_v63 }
 0x2da   : > { %3205 = vmatprep.subr.bf16.mxu1 %v3500_v24 }
 0x2dd   : > { %3206 = vmatpush3.bf16.msra.mxu1 %v3500_v24 }
 0x2de   : > { %3207 = vmatprep.subr.bf16.mxu1 %v3501_v50 }
 0x2e1   : > { %3208 = vmatpush3.bf16.msra.mxu1 %v3501_v50 }
 0x2e2   : > { %2300 = vmatprep.subr.bf16.mxu1 %v3681_v59 }
 0x2e4   : > { %3210 = vmatmul.mubr.msk.bf16.vlgmr.msra.gmra.mrb[4].mxu1 %vm1033_vm5, %v1040_v25 }
 0x2e5   : > { %3213 = vmatprep.mubr.msk.bf16.mxu1 %vm1033_vm5, %v1041_v61 }
 0x2ec   : > { %3214 = vmatmul.mubr.msk.bf16.gmra.mrb[8].mxu1 %vm1033_vm5, %v1309_v48 }
 0x3b7   : > { %v3211_v60 = vpop.f32.mrb[4].mxu1 }
 0x3b8   : > { %v1396_v45 = vpop.f32.mrb[5].mxu1  ;;  %v1444_v46 = vadd.f32 %v3211_v60, %v2877_v37 }
 0x3b9   : > { %v1442_v20 = vadd.f32 %v2877_v37, %v1396_v45  ;;  %v3212_v18 = vpop.f32.mrb[6].mxu1 }
 0x3ba   : > { %v1399_v16 = vpop.f32.mrb[7].mxu1  ;;  %v1445_v17 = vadd.f32 %v3212_v18, %v2877_v37  ;;  %v4268_v35 = vadd.f32 %v2878_v33, %v1444_v46 }
 0x3bb   : > { %v1443_v25 = vadd.f32 %v2877_v37, %v1399_v16  ;;  %v4260_v32 = vadd.f32 %v2878_v33, %v1442_v20 }
 0x3bc   : > { %v4264_v61 = vadd.f32 %v2878_v33, %v1445_v17  ;;  %v1537_v18 = vmul.f32 %v4268_v35, %v4268_v35 }
 0x3bd   : > { %v4262_v31 = vadd.f32 %v2878_v33, %v1443_v25  ;;  %v1535_v60 = vmul.f32 %v4260_v32, %v4260_v32 }
 0x3be   : > { %v3320_v56 = vpack.c.bf16 %v4264_v61, %v4268_v35  ;;  %v1538_v45 = vmul.f32 %v4264_v61, %v4264_v61 }
 0x3bf   : > { %v3317_v1 = vpack.c.bf16 %v4262_v31, %v4260_v32  ;;  %v3215_v28 = vpop.f32.mrb[8].mxu1  ;;  %v1536_v48 = vmul.f32 %v4262_v31, %v4262_v31 }
 0x3c0   : > { %v1412_v10 = vpop.f32.mrb[9].mxu1  ;;  %v1448_v34 = vadd.f32 %v3215_v28, %v2877_v37  ;;  %v3332_v16 = vpack.c.bf16 %v1538_v45, %v1537_v18 }
 0x3c1   : > { %v1446_v11 = vadd.f32 %v2877_v37, %v1412_v10  ;;  %v3216_v12 = vpop.f32.mrb[10].mxu1  ;;  %3318 = vmatpush3.bf16.msra.mxu0 %v3317_v1  ;;  %v3329_v20 = vpack.c.bf16 %v1536_v48, %v1535_v60  ;;  %v4805_v10 = vcvt.s32.f32 %v3812_v4 }
 0x3c2   : > { %v1415_v57 = vpop.f32.mrb[11].mxu1  ;;  %3319 = vmatprep.subr.bf16.mxu0 %v3676_v0  ;;  %v1449_v39 = vadd.f32 %v3216_v12, %v2877_v37  ;;  %v4282_v50 = vadd.f32 %v2878_v33, %v1448_v34  ;;  %v1622_v34 = vmul.f32 0.5, %v3927_v19 }
 0x3c3   : > { %v1447_v40 = vadd.f32 %v2877_v37, %v1415_v57  ;;  %v4273_v47 = vadd.f32 %v2878_v33, %v1446_v11  ;;  %v1634_v11 = vmul.f32 0.5, %v4805_v10  ;;  %v1618_v57 = vmul.f32 0.5, %v3825_v9  ;;  %v3510_v10 = vld [vmem:[%s4783_s8 + $0x20] sm:$0xff]  }
 0x3c4   : > { %v4278_v63 = vadd.f32 %v2878_v33, %v1449_v39  ;;  %v1541_v1 = vmul.f32 %v4282_v50, %v4282_v50  ;;  %v1620_v39 = vmul.f32 0.5, %v3912_v42  ;;  %v1630_v60 = vfloor.f32 %v1622_v34  ;;  %v3517_v34 = vld [vmem:[%s4783_s8 + $0x98] sm:$0xff]  }
 0x3c5   : > { %v4275_v55 = vadd.f32 %v2878_v33, %v1447_v40  ;;  %3321 = vmatpush3.bf16.msra.mxu0 %v3320_v56  ;;  %v1539_v17 = vmul.f32 %v4273_v47, %v4273_v47  ;;  %v1635_v12 = vfloor.f32 %v1634_v11  ;;  %v1619_v56 = vmul.f32 0.5, %v3858_v23  ;;  %v3511_v11 = vld [vmem:[%s4783_s8 + $0x80] sm:$0xff]  }
 0x3c6   : > { %3322 = vmatprep.subr.bf16.mxu0 %v3676_v0  ;;  %v3326_v37 = vpack.c.bf16 %v4278_v63, %v4282_v50  ;;  %v1542_v25 = vmul.f32 %v4278_v63, %v4278_v63  ;;  %v1621_v40 = vmul.f32 0.5, %v3914_v43  ;;  %v4806_v9 = vmov 1.0|1.0  }
 0x3c7   : > { %v3323_v24 = vpack.c.bf16 %v4275_v55, %v4273_v47  ;;  %v1540_v33 = vmul.f32 %v4275_v55, %v4275_v55  ;;  %v1627_v48 = vfloor.f32 %v1619_v56  ;;  %vm1640_vm14 = vcmp.eq.f32.partialorder %v1630_v60, %v1635_v12  ;;  %v3514_v56 = vld [vmem:[%s4783_s8 + $0x30] sm:$0xff]  }
 0x3c8   : > { %v3338_v28 = vpack.c.bf16 %v1542_v25, %v1541_v1  ;;  %v1624_v23 = vmul.f32 0.5, %v3977_v8  ;;  %v1625_v42 = vmul.f32 0.5, %v3981_v27  ;;  %v3502_v8 = vld [vmem:[%s4783_s8] sm:$0xff]   ;;  %v3506_v25 = vld [vmem:[%s4783_s8 + $0x10] sm:$0xff]   ;;  %v3508_v1 = vld [vmem:[%s4783_s8 + $0x18] sm:$0xff]  }
 0x3c9   : > { %3324 = vmatpush3.bf16.msra.mxu0 %v3323_v24  ;;  %v3335_v46 = vpack.c.bf16 %v1540_v33, %v1539_v17  ;;  %v1623_v24 = vmul.f32 0.5, %v3934_v22  ;;  %vm1637_vm6 = vcmp.eq.f32.partialorder %v1627_v48, %v1635_v12  ;;  %v3503_v27 = vld [vmem:[%s4783_s8 + $0x60] sm:$0xff]   ;;  %2301 = vmatpush1.bf16.msra.mxu1 %v3502_v8  ;;  %v3505_v17 = vld [vmem:[%s4783_s8 + $0x68] sm:$0xff]   ;;  %v4808_v8 = vsub.s32 0, %v3809_v3 }
 0x3ca   : > { %3325 = vmatprep.subr.bf16.mxu0 %v3676_v0  ;;  %v1632_v43 = vfloor.f32 %v1624_v23  ;;  %v1633_v19 = vfloor.f32 %v1625_v42  ;;  %2302 = vmatprep.subr.bf16.mxu1 %v3681_v59  ;;  %v2890_v23 = vld [vmem:[%s4781_s6] ss:$0 sm:$0xff] }
 0x3cb   : > { %v1631_v4 = vfloor.f32 %v1623_v24 }
 0x3cc   : > { %vm1642_vm5 = vcmp.eq.f32.partialorder %v1632_v43, %v1635_v12 }
 0x3cd   : > { %3327 = vmatpush3.bf16.msra.mxu0 %v3326_v37  ;;  %v1628_v37 = vfloor.f32 %v1620_v39  ;;  %vm1641_vm15 = vcmp.eq.f32.partialorder %v1631_v4, %v1635_v12  ;;  %v3515_v39 = vld [vmem:[%s4783_s8 + $0x90] sm:$0xff]  }
 0x3ce   : > { %3328 = vmatprep.subr.bf16.mxu0 %v3676_v0  ;;  %vm3347_vm3 = vmpackc.low %vm1641_vm15, %vm1640_vm14 }
 0x3cf   : > { %vm1638_vm7 = vcmp.eq.f32.partialorder %v1628_v37, %v1635_v12 }
 0x3d0   : > { %3234 = vmatmul.mubr.msk.f32.vlgmr.msra.gmra.mrb[2].mxu0 %vm525_vm1, %v3679_v38 }
 0x3d1   : > { %3330 = vmatpush3.bf16.msra.mxu0 %v3329_v20  ;;  %3252 = vmatprep.mubr.msk.f32.mxu0 %vm3677_vm0, %v3678_v2 }
 0x3d2   : > { %3331 = vmatprep.subr.bf16.mxu0 %v3676_v0 }
 0x3d5   : > { %3333 = vmatpush3.bf16.msra.mxu0 %v3332_v16  ;;  %v3504_v16 = vld [vmem:[%s4783_s8 + $0x8] sm:$0xff]  }
 0x3d6   : > { %3334 = vmatprep.subr.bf16.mxu0 %v3676_v0  ;;  %2303 = vmatpush1.bf16.msra.mxu1 %v3504_v16 }
 0x3d7   : > { %2304 = vmatprep.subr.bf16.mxu1 %v3681_v59 }
 0x3d9   : > { %3336 = vmatpush3.bf16.msra.mxu0 %v3335_v46  ;;  %v3507_v46 = vld [vmem:[%s4783_s8 + $0x70] sm:$0xff]  }
 0x3da   : > { %3337 = vmatprep.subr.bf16.mxu0 %v3676_v0  ;;  %2305 = vmatpush1.bf16.msra.mxu1 %v3506_v25 }
 0x3db   : > { %2306 = vmatprep.subr.bf16.mxu1 %v3681_v59 }
 0x3dd   : > { %3339 = vmatpush3.bf16.msra.mxu0 %v3338_v28  ;;  %v3509_v28 = vld [vmem:[%s4783_s8 + $0x78] sm:$0xff]  }
 0x3de   : > { %3340 = vmatprep.subr.bf16.mxu0 %v3676_v0  ;;  %2307 = vmatpush1.bf16.msra.mxu1 %v3508_v1 }
 0x3df   : > { %2308 = vmatprep.subr.bf16.mxu1 %v3681_v59 }
 0x3e0   : > { %3253 = vmatmul.mubr.msk.f32.vlgmr.msra.gmra.mrb[4].mxu0 %vm525_vm1, %v3679_v38  ;;  %v1626_v38 = vfloor.f32 %v1618_v57  ;;  %v3513_v57 = vld [vmem:[%s4783_s8 + $0x88] sm:$0xff]  }
 0x3e1   : > { %3271 = vmatprep.mubr.msk.f32.mxu0 %vm3677_vm0, %v3678_v2  ;;  %v1629_v2 = vfloor.f32 %v1621_v40  ;;  %v3516_v40 = vld [vmem:[%s4783_s8 + $0x38] sm:$0xff]  }
 0x3e2   : > { %vm1636_vm0 = vcmp.eq.f32.partialorder %v1626_v38, %v1635_v12  ;;  %2309 = vmatpush1.bf16.msra.mxu1 %v3510_v10 }
 0x3e3   : > { %vm1639_vm10 = vcmp.eq.f32.partialorder %v1629_v2, %v1635_v12  ;;  %vm3341_vm11 = vmpackc.low %vm1637_vm6, %vm1636_vm0  ;;  %vm1643_vm0 = vcmp.eq.f32.partialorder %v1633_v19, %v1635_v12  ;;  %v3512_v12 = vld [vmem:[%s4783_s8 + $0x28] sm:$0xff]   ;;  %2310 = vmatprep.subr.bf16.mxu1 %v3681_v59 }
 0x3e4   : > { %3342 = vmatpush3.bf16.msk.msra.mxu0 %vm3341_vm11, %v4806_v9  ;;  %vm3344_vm12 = vmpackc.low %vm1639_vm10, %vm1638_vm7  ;;  %vm1930_vm7 = vcmask 523268   ;;  %vm1927_vm10 = vcmask 519168  }
 0x3e5   : > { %3343 = vmatprep.subr.bf16.mxu0 %v3676_v0  ;;  %vm3350_vm6 = vmpackc.low %vm1643_vm0, %vm1642_vm5  ;;  %1931 = vst.msk [vmem:[#allocation3 + $0x48] sm:$0xf0] %vm1930_vm7, %v3681_v59 }
 0x3e6   : > { %1928 = vst.msk [vmem:[#allocation3 + $0x8] sm:$0xf] %vm1927_vm10, %v3681_v59  ;;  %2311 = vmatpush1.bf16.msra.mxu1 %v3512_v12 }
 0x3e7   : > { %2312 = vmatprep.subr.bf16.mxu1 %v3681_v59 }
 0x3e8   : > { %3345 = vmatpush3.bf16.msk.msra.mxu0 %vm3344_vm12, %v4806_v9 }
 0x3e9   : > { %3346 = vmatprep.subr.bf16.mxu0 %v3676_v0 }
 0x3ea   : > { %2313 = vmatpush1.bf16.msra.mxu1 %v3514_v56 }
 0x3eb   : > { %2314 = vmatprep.subr.bf16.mxu1 %v3681_v59 }
 0x3ec   : > { %3348 = vmatpush3.bf16.msk.msra.mxu0 %vm3347_vm3, %v4806_v9 }
 0x3ed   : > { %3349 = vmatprep.subr.bf16.mxu0 %v3676_v0 }
 0x3ee   : > { %2315 = vmatpush1.bf16.msra.mxu1 %v3516_v40 }
 0x3ef   : > { %2316 = vmatprep.subr.bf16.mxu1 %v3681_v59 }
 0x3f0   : > { %3351 = vmatpush3.bf16.msk.msra.mxu0 %vm3350_vm6, %v4806_v9 }
 0x3f1   : > { %2151 = vmatprep.subr.bf16.mxu0 %v3681_v59 }
 0x4a3   : > { %v1531_v22 = vpop.f32.mrb[2].mxu0 }
 0x4a4   : > { %v3235_v45 = vpop.f32.mrb[3].mxu0 }
 0x4a5   : > { %v4807_v45 = vsub.s32 1, %v3809_v3 }
 0x4b3   : > { %v1609_v20 = vpop.f32.mrb[4].mxu0 }
 0x4b4   : > { %v1614_v18 = vrot.slane %v1609_v20, 7  ;;  %v3254_v33 = vpop.f32.mrb[5].mxu0 }
 0x4b6   : > { %v1616_v0 = vsel %vm680_vm8, %v1531_v22, %v1614_v18  ;;  %v1742_v22 = vld [vmem:[%s4782_s7] sm:$0x1] }
 0x4b7   : > { %3272 = vmatmul.mubr.msk.f32.vlgmr.msra.gmra.mrb[6].mxu0 %vm525_vm1, %v1616_v0 }
 0x4b8   : > { %2152 = vmatpush1.bf16.msra.mxu0 %v3503_v27 }
 0x4b9   : > { %2153 = vmatprep.subr.bf16.mxu0 %v3681_v59 }
 0x4bc   : > { %2154 = vmatpush1.bf16.msra.mxu0 %v3505_v17 }
 0x4bd   : > { %2155 = vmatprep.subr.bf16.mxu0 %v3681_v59 }
 0x4c0   : > { %2156 = vmatpush1.bf16.msra.mxu0 %v3507_v46 }
 0x4c1   : > { %2157 = vmatprep.subr.bf16.mxu0 %v3681_v59 }
 0x4c4   : > { %2158 = vmatpush1.bf16.msra.mxu0 %v3509_v28 }
 0x4c5   : > { %2159 = vmatprep.subr.bf16.mxu0 %v3681_v59 }
 0x4c8   : > { %2160 = vmatpush1.bf16.msra.mxu0 %v3511_v11 }
 0x4c9   : > { %2161 = vmatprep.subr.bf16.mxu0 %v3681_v59 }
 0x4cc   : > { %2162 = vmatpush1.bf16.msra.mxu0 %v3513_v57 }
 0x4cd   : > { %2163 = vmatprep.subr.bf16.mxu0 %v3681_v59 }
 0x4d0   : > { %2164 = vmatpush1.bf16.msra.mxu0 %v3515_v39 }
 0x4d1   : > { %2165 = vmatprep.subr.bf16.mxu0 %v3681_v59 }
 0x4d4   : > { %2166 = vmatpush1.bf16.msra.mxu0 %v3517_v34 }
 0x4d5   : > { %2167 = vmatprep.subr.bf16.mxu0 %v3681_v59 }
 0x58a   : > { %v1721_v24 = vpop.f32.mrb[6].mxu0 }
 0x58b   : > { %v1725_v38 = vmul.f32 0.0078125, %v1721_v24  ;;  %v3273_v48 = vpop.f32.mrb[7].mxu0 }
 0x58d   : > { %v1726_v37 = vmul.f32 %v1725_v38, %v1725_v38 }
 0x58f   : > { %v1728_v2 = vrot.slane %v1726_v37, 7 }
 0x591   : > { %v1730_v60 = vsub.f32 %v1725_v38, %v1728_v2 }
 0x593   : > { %v1731_v4 = vmax.f32 %v1730_v60, 0.0 }
 0x595   : > { %v1732_v9 = vadd.f32 1e-05, %v1731_v4 }
 0x597   : > { %3578 = vrsqrt.f32 %v1732_v9 }
 0x5a1   : > { %v3579_v42 = vpop.eup %3578 }
 0x5a2   : > { %v1741_v43 = vmul.f32 %v3579_v42, %v2890_v23 }
 0x5a4   : > { %v1744_v19 = vrot.slane %v1741_v43, 1  ;;  %v1751_v20 = vrot.slane %v1741_v43, %v4807_v45 }
 0x5a6   : > { %v1746_v18 = vmul.f32 %v1744_v19, %v1725_v38  ;;  %v1754_v0 = vmul.f32 %v1751_v20, %v4268_v35  ;;  %v1755_v16 = vmul.f32 %v1751_v20, %v4264_v61  ;;  %v1752_v17 = vmul.f32 %v1751_v20, %v4260_v32 }
 0x5a7   : > { %v1753_v25 = vmul.f32 %v1751_v20, %v4262_v31  ;;  %v1758_v46 = vmul.f32 %v1751_v20, %v4282_v50  ;;  %v1759_v1 = vmul.f32 %v1751_v20, %v4278_v63  ;;  %v1756_v28 = vmul.f32 %v1751_v20, %v4273_v47 }
 0x5a8   : > { %v1747_v33 = vsub.f32 %v1742_v22, %v1746_v18  ;;  %v1757_v10 = vmul.f32 %v1751_v20, %v4275_v55 }
 0x5aa   : > { %v1764_v27 = vrot.slane %v1747_v33, %v4808_v8 }
 0x5ac   : > { %v1768_v11 = vadd.f32 %v1764_v27, %v1754_v0  ;;  %v4422_v12 = vadd.f32 %v1764_v27, %v1755_v16  ;;  %v4424_v35 = vadd.f32 %v1764_v27, %v1752_v17  ;;  %v4426_v57 = vadd.f32 %v1764_v27, %v1753_v25 }
 0x5ad   : > { %v4428_v61 = vadd.f32 %v1764_v27, %v1758_v46  ;;  %v4430_v32 = vadd.f32 %v1764_v27, %v1759_v1  ;;  %v4432_v31 = vadd.f32 %v1764_v27, %v1756_v28  ;;  %v4434_v50 = vadd.f32 %v1764_v27, %v1757_v10  ;;  %v3518_v28 = vld [vmem:[%s4783_s8 + $0x40] sm:$0xff]  }
 0x5ae   : > { %v1776_v63 = vsub.f32 0.0, %v1768_v11  ;;  %v1777_v47 = vsub.f32 0.0, %v4422_v12  ;;  %v1774_v55 = vsub.f32 0.0, %v4424_v35  ;;  %v1775_v56 = vsub.f32 0.0, %v4426_v57  ;;  %2317 = vmatpush1.bf16.msra.mxu1 %v3518_v28 }
 0x5af   : > { %v1780_v39 = vsub.f32 0.0, %v4428_v61  ;;  %v1781_v40 = vsub.f32 0.0, %v4430_v32  ;;  %v1778_v34 = vsub.f32 0.0, %v4432_v31  ;;  %v1779_v2 = vsub.f32 0.0, %v4434_v50  ;;  %2318 = vmatprep.subr.bf16.mxu1 %v3681_v59 }
 0x5b0   : > { %v1786_v24 = vmul.f32 1.442695, %v1776_v63  ;;  %v1788_v38 = vmul.f32 1.442695, %v1777_v47  ;;  %v1782_v48 = vmul.f32 1.442695, %v1774_v55 }
 0x5b1   : > { %v1784_v37 = vmul.f32 1.442695, %v1775_v56  ;;  %v1794_v60 = vmul.f32 1.442695, %v1780_v39  ;;  %v1796_v4 = vmul.f32 1.442695, %v1781_v40 }
 0x5b2   : > { %3580 = vpow2.f32 %v1786_v24  ;;  %v1790_v9 = vmul.f32 1.442695, %v1778_v34  ;;  %v1792_v23 = vmul.f32 1.442695, %v1779_v2  ;;  %v3519_v63 = vld [vmem:[%s4783_s8 + $0xa0] sm:$0xff]  }
 0x5b3   : > { %3582 = vpow2.f32 %v1788_v38  ;;  %2168 = vmatpush1.bf16.msra.mxu0 %v3519_v63 }
 0x5b4   : > { %3584 = vpow2.f32 %v1782_v48  ;;  %2169 = vmatprep.subr.bf16.mxu0 %v3681_v59 }
 0x5b5   : > { %3586 = vpow2.f32 %v1784_v37 }
 0x5b6   : > { %3588 = vpow2.f32 %v1794_v60 }
 0x5b7   : > { %3590 = vpow2.f32 %v1796_v4 }
 0x5b8   : > { %3592 = vpow2.f32 %v1790_v9 }
 0x5b9   : > { %3594 = vpow2.f32 %v1792_v23 }
 0x5bc   : > { %v3581_v42 = vpop.eup %3580 }
 0x5bd   : > { %v3583_v43 = vpop.eup %3582  ;;  %v1800_v19 = vadd.f32 1.0, %v3581_v42 }
 0x5be   : > { %v3585_v22 = vpop.eup %3584  ;;  %v1801_v45 = vadd.f32 1.0, %v3583_v43 }
 0x5bf   : > { %v3587_v20 = vpop.eup %3586  ;;  %3596 = vrcp.f32 %v1800_v19  ;;  %v1798_v18 = vadd.f32 1.0, %v3585_v22  ;;  %v3520_v19 = vld [vmem:[%s4783_s8 + $0x48] sm:$0xff]  }
 0x5c0   : > { %v3589_v33 = vpop.eup %3588  ;;  %3598 = vrcp.f32 %v1801_v45  ;;  %v1799_v0 = vadd.f32 1.0, %v3587_v20  ;;  %2319 = vmatpush1.bf16.msra.mxu1 %v3520_v19 }
 0x5c1   : > { %v3591_v8 = vpop.eup %3590  ;;  %3600 = vrcp.f32 %v1798_v18  ;;  %v1804_v27 = vadd.f32 1.0, %v3589_v33  ;;  %v3522_v33 = vld [vmem:[%s4783_s8 + $0x50] sm:$0xff]   ;;  %2320 = vmatprep.subr.bf16.mxu1 %v3681_v59 }
 0x5c2   : > { %v3593_v16 = vpop.eup %3592  ;;  %3602 = vrcp.f32 %v1799_v0  ;;  %v1805_v17 = vadd.f32 1.0, %v3591_v8 }
 0x5c3   : > { %v3595_v25 = vpop.eup %3594  ;;  %3604 = vrcp.f32 %v1804_v27  ;;  %v1802_v46 = vadd.f32 1.0, %v3593_v16 }
 0x5c4   : > { %3606 = vrcp.f32 %v1805_v17  ;;  %v1803_v1 = vadd.f32 1.0, %v3595_v25  ;;  %2321 = vmatpush1.bf16.msra.mxu1 %v3522_v33 }
 0x5c5   : > { %3608 = vrcp.f32 %v1802_v46  ;;  %2322 = vmatprep.subr.bf16.mxu1 %v3681_v59 }
 0x5c6   : > { %3610 = vrcp.f32 %v1803_v1 }
 0x5c9   : > { %v3597_v10 = vpop.eup %3596 }
 0x5ca   : > { %v3599_v47 = vpop.eup %3598  ;;  %v1824_v55 = vmul.f32 %v3597_v10, %v1768_v11 }
 0x5cb   : > { %v3601_v56 = vpop.eup %3600  ;;  %v1825_v39 = vmul.f32 %v3599_v47, %v4422_v12 }
 0x5cc   : > { %v3603_v40 = vpop.eup %3602  ;;  %v1832_v34 = vmul.f32 %v1824_v55, %v4036_v49  ;;  %v4453_v24 = vmul.f32 %v1824_v55, %v4023_v15  ;;  %v1822_v38 = vmul.f32 %v3601_v56, %v4424_v35  ;;  %v3525_v56 = vld [vmem:[%s4783_s8 + $0xb8] sm:$0xff]  }
 0x5cd   : > { %v3605_v48 = vpop.eup %3604  ;;  %v4458_v37 = vmul.f32 %v1825_v39, %v4040_v51  ;;  %v4461_v11 = vmul.f32 %v1825_v39, %v4027_v14  ;;  %v3465_v2 = vpack.i.bf16 %v1825_v39, %v1824_v55  ;;  %v1823_v12 = vmul.f32 %v3603_v40, %v4426_v57  ;;  %v3524_v55 = vld [vmem:[%s4783_s8 + $0x58] sm:$0xff]  }
 0x5ce   : > { %v3607_v60 = vpop.eup %3606  ;;  %v1864_v4 = vrot.slane %v1832_v34, 1  ;;  %v1830_v49 = vmul.f32 %v1822_v38, %v4030_v26  ;;  %v4466_v15 = vmul.f32 %v1822_v38, %v4005_v30  ;;  %v4469_v35 = vmul.f32 %v3605_v48, %v4428_v61  ;;  %2323 = vmatpush1.bf16.msra.mxu1 %v3524_v55 }
 0x5cf   : > { %v3609_v9 = vpop.eup %3608  ;;  %v1865_v51 = vrot.slane %v4458_v37, 1  ;;  %3466 = vrot.lane.b32.xlu1 %v3465_v2, %s4809_s16  ;;  %v1831_v14 = vmul.f32 %v1823_v12, %v4033_v29  ;;  %v1839_v23 = vmul.f32 %v1823_v12, %v4019_v41  ;;  %v3460_v57 = vpack.i.bf16 %v1823_v12, %v1822_v38  ;;  %v3521_v29 = vld [vmem:[%s4783_s8 + $0xa8] sm:$0xff]  }
 0x5d0   : > { %v3611_v42 = vpop.eup %3610  ;;  %v1862_v43 = vrot.slane %v1830_v49, 1  ;;  %v1829_v26 = vmul.f32 %v3607_v60, %v4430_v32  ;;  %v1836_v30 = vmul.f32 %v4469_v35, %v4055_v54  ;;  %v1826_v61 = vmul.f32 %v3609_v9, %v4432_v31  ;;  %2170 = vmatpush1.bf16.msra.mxu0 %v3521_v29 }
 0x5d1   : > { %v1874_v41 = vsel %vm918_vm13, %v1864_v4, %v1865_v51  ;;  %v1863_v22 = vrot.slane %v1831_v14, 1  ;;  %3461 = vrot.lane.b32.xlu0 %v3460_v57, %s4809_s16  ;;  %v1827_v32 = vmul.f32 %v3611_v42, %v4434_v50  ;;  %v1849_v54 = vrot.slane %v4461_v11, 7  ;;  %v3523_v50 = vld [vmem:[%s4783_s8 + $0xb0] sm:$0xff]   ;;  %2171 = vmatprep.subr.bf16.mxu0 %v3681_v59  ;;  %v3534_v11 = vld [vmem:[%s4785_s10] sm:$0xff]  }
 0x5d2   : > { %v1837_v31 = vmul.f32 %v1829_v26, %v4064_v44  ;;  %v4492_v45 = vmul.f32 %v1829_v26, %v4061_v58  ;;  %v3475_v20 = vpack.i.bf16 %v1829_v26, %v4469_v35  ;;  %v1868_v18 = vrot.slane %v1836_v30, 1  ;;  %3274 = vmatprep.subr.bf16.mxu1 %v3534_v11 }
 0x5d3   : > { %v1875_v0 = vsel %vm918_vm13, %v1863_v22, %v1864_v4  ;;  %v1876_v58 = vsel %vm918_vm13, %v1862_v43, %v1863_v22  ;;  %v1835_v44 = vmul.f32 %v1827_v32, %v4050_v53  ;;  %v3470_v8 = vpack.i.bf16 %v1827_v32, %v1826_v61 }
 0x5d4   : > { %v1919_v27 = vpack.c.bf16 %v1875_v0, %v1876_v58  ;;  %v1869_v16 = vrot.slane %v1837_v31, 1  ;;  %3476 = vrot.lane.b32.xlu1 %v3475_v20, %s4809_s16  ;;  %v1834_v17 = vmul.f32 %v1826_v61, %v4045_v52  ;;  %v1847_v25 = vrot.slane %v1839_v23, 7  ;;  %2172 = vmatpush1.bf16.msra.mxu0 %v3523_v50 }
 0x5d5   : > { %v1867_v46 = vrot.slane %v1835_v44, 1  ;;  %3471 = vrot.lane.b32.xlu0 %v3470_v8, %s4809_s16  ;;  %v1848_v1 = vrot.slane %v4453_v24, 7  ;;  %v1853_v28 = vrot.slane %v4492_v45, 7  ;;  %v1846_v53 = vrot.slane %v4466_v15, 7  ;;  %2173 = vmatprep.subr.bf16.mxu0 %v3681_v59 }
 0x5d6   : > { %v1941_v10 = vrot.slane %v1919_v27, 4  ;;  %v1870_v63 = vsel %vm918_vm13, %v1868_v18, %v1869_v16  ;;  %v1877_v47 = vsel %vm918_vm13, %v1869_v16, %v1862_v43  ;;  %v1866_v52 = vrot.slane %v1834_v17, 1 }
 0x5d7   : > { %v1925_v39 = vpack.c.bf16 %v1877_v47, %v1870_v63  ;;  %v1871_v40 = vsel %vm918_vm13, %v1867_v46, %v1868_v18  ;;  %v1858_v34 = vsel %vm901_vm2, %v1848_v1, %v1849_v54  ;;  %v1859_v24 = vsel %vm901_vm2, %v1847_v25, %v1848_v1 }
 0x5d8   : > { %1965 = vst.msk [vmem:[#allocation3 + $0x8] sm:$0xf0] %vm1930_vm7, %v1941_v10  ;;  %v1872_v38 = vsel %vm918_vm13, %v1866_v52, %v1867_v46  ;;  %v1873_v48 = vsel %vm918_vm13, %v1865_v51, %v1866_v52  ;;  %v1860_v37 = vsel %vm901_vm2, %v1846_v53, %v1847_v25  ;;  %v1861_v2 = vsel %vm901_vm2, %v1853_v28, %v1846_v53 }
 0x5d9   : > { %v1952_v12 = vrot.slane %v1925_v39, 4  ;;  %v1921_v60 = vpack.c.bf16 %v1873_v48, %v1874_v41  ;;  %v1923_v4 = vpack.c.bf16 %v1871_v40, %v1872_v38  ;;  %v1843_v49 = vmul.f32 %v1827_v32, %v4001_v21  ;;  %2174 = vmatpush1.bf16.msra.mxu0 %v3525_v56 }
 0x5da   : > { %v1844_v15 = vmul.f32 %v4469_v35, %v4120_v36  ;;  %v1842_v9 = vmul.f32 %v1826_v61, %v3998_v62  ;;  %2467 = vmatprep.subr.bf16.mxu0 %v3681_v59 }
 0x5db   : > { %1973 = vst.msk [vmem:[#allocation3 + $0x48] sm:$0xf] %vm1927_vm10, %v1952_v12  ;;  %v1944_v51 = vrot.slane %v1921_v60, 4  ;;  %v1948_v14 = vrot.slane %v1923_v4, 4  ;;  %v1851_v23 = vrot.slane %v1843_v49, 7 }
 0x5dc   : > { %v1852_v57 = vrot.slane %v1844_v15, 7  ;;  %v1850_v42 = vrot.slane %v1842_v9, 7 }
 0x5dd   : > { %v1949_v43 = vsel %vm1019_vm4, %v1944_v51, %v1948_v14  ;;  %v1945_v21 = vsel %vm1019_vm4, %v1941_v10, %v1944_v51  ;;  %v1953_v26 = vsel %vm1019_vm4, %v1948_v14, %v1952_v12  ;;  %v3539_v12 = vld [vmem:[%s4785_s10 + $0x8] sm:$0xff]   ;;  %v3526_v51 = vld [vmem:[%s4783_s8 + $0xc0] sm:$0xff]  }
 0x5de   : > { %1969 = vst.msk [vmem:[#allocation3 + $0x28] sm:$0xff] %vm525_vm1, %v1949_v43  ;;  %1967 = vst.msk [vmem:[#allocation3 + $0x18] sm:$0xff] %vm525_vm1, %v1945_v21  ;;  %v1854_v62 = vsel %vm901_vm2, %v1852_v57, %v1853_v28  ;;  %v1855_v36 = vsel %vm901_vm2, %v1851_v23, %v1852_v57  ;;  %v1856_v35 = vsel %vm901_vm2, %v1850_v42, %v1851_v23  ;;  %v3527_v57 = vld [vmem:[%s4783_s8 + $0xc8] sm:$0xff]   ;;  %v3528_v21 = vld [vmem:[%s4783_s8 + $0xd0] sm:$0xff]  }
 0x5df   : > { %1971 = vst.msk [vmem:[#allocation3 + $0x38] sm:$0xff] %vm525_vm1, %v1953_v26  ;;  %v1857_v30 = vsel %vm901_vm2, %v1849_v54, %v1850_v42  ;;  %v1975_v61 = vld [vmem:[#allocation3 + $0x8] sm:$0xff] }
 0x5e0   : > { %2943 = vmatprep.mubr.msk.bf16.mxu1 %vm525_vm1, %v1975_v61  ;;  %v2007_v19 = vld [vmem:[#allocation3 + $0x8] sm:$0xf0]  ;;  %v3530_v61 = vld [vmem:[%s4783_s8 + $0xe0] sm:$0xff]  }
 0x5e1   : > { %v2048_v29 = vrot.slane %v2007_v19, 4 }
 0x5e5   : > { %v4566_v41 = vld [vmem:[#allocation3 + $0x18] sm:$0xff]  ;;  %v4591_v48 = vld [vmem:[#allocation3 + $0x28] sm:$0xff] }
 0x5e6   : > { %v2049_v22 = vrot.slane %v4566_v41, 4  ;;  %v2053_v49 = vrot.slane %v4591_v48, 4  ;;  %v1981_v42 = vld [vmem:[#allocation3 + $0x38] sm:$0xff] }
 0x5e7   : > { %v2057_v43 = vrot.slane %v1981_v42, 4 }
 0x5e8   : > { %v2050_v32 = vsel %vm1019_vm4, %v2048_v29, %v2049_v22  ;;  %v2054_v23 = vsel %vm1019_vm4, %v2049_v22, %v2053_v49 }
 0x5e9   : > { %2927 = vmatprep.mubr.msk.bf16.mxu0 %vm525_vm1, %v2050_v32  ;;  %v2058_v26 = vsel %vm1019_vm4, %v2053_v49, %v2057_v43  ;;  %v3531_v32 = vld [vmem:[%s4783_s8 + $0xe8] sm:$0xff]  }
 0x641   : > { %v3467_v3 = vpop.permute.xlu1 %3466 }
 0x642   : > { %v3469_v54 = vunpack.i.h.bf16 %v3467_v3  ;;  %v3468_v31 = vunpack.i.l.bf16 %v3467_v3  ;;  %v3532_v3 = vld [vmem:[%s4783_s8 + $0xf0] sm:$0xff]  }
 0x643   : > { %v3462_v45 = vpop.permute.xlu0 %3461 }
 0x644   : > { %v1912_v20 = vsel %vm525_vm1, %v1859_v24, %v3468_v31  ;;  %v1913_v18 = vsel %vm525_vm1, %v1858_v34, %v3469_v54  ;;  %v3464_v33 = vunpack.i.h.bf16 %v3462_v45  ;;  %v3463_v50 = vunpack.i.l.bf16 %v3462_v45  ;;  %v3533_v31 = vld [vmem:[%s4783_s8 + $0xf8] sm:$0xff]   ;;  %v3535_v45 = vld [vmem:[%s4783_s8 + $0x100] sm:$0xff]  }
 0x645   : > { %v1920_v0 = vpack.c.bf16 %v1913_v18, %v1912_v20 }
 0x646   : > { %v1910_v58 = vsel %vm525_vm1, %v1861_v2, %v3463_v50  ;;  %v1911_v44 = vsel %vm525_vm1, %v1860_v37, %v3464_v33  ;;  %v3477_v8 = vpop.permute.xlu1 %3476 }
 0x647   : > { %v1942_v27 = vrot.slane %v1920_v0, 4  ;;  %v1918_v16 = vpack.c.bf16 %v1911_v44, %v1910_v58  ;;  %v3479_v17 = vunpack.i.h.bf16 %v3477_v8  ;;  %v3478_v25 = vunpack.i.l.bf16 %v3477_v8  ;;  %v3472_v46 = vpop.permute.xlu0 %3471 }
 0x648   : > { %v3474_v1 = vunpack.i.h.bf16 %v3472_v46  ;;  %v3473_v28 = vunpack.i.l.bf16 %v3472_v46 }
 0x649   : > { %v1940_v53 = vrot.slane %v1918_v16, 4  ;;  %v1917_v10 = vsel %vm525_vm1, %v1854_v62, %v3479_v17  ;;  %v1916_v63 = vsel %vm525_vm1, %v1855_v36, %v3478_v25  ;;  %v3529_v62 = vld [vmem:[%s4783_s8 + $0xd8] sm:$0xff]   ;;  %v2009_v36 = vld [vmem:[#allocation3 + $0x48] sm:$0xf] }
 0x64a   : > { %v1924_v47 = vpack.c.bf16 %v1917_v10, %v1916_v63  ;;  %v1915_v52 = vsel %vm525_vm1, %v1856_v35, %v3474_v1  ;;  %v1914_v55 = vsel %vm525_vm1, %v1857_v30, %v3473_v28  ;;  %v2061_v30 = vrot.slane %v2009_v36, 4 }
 0x64b   : > { %v4583_v56 = vsel %vm1019_vm4, %v1940_v53, %v1942_v27  ;;  %1964 = vst [vmem:[#allocation3] sm:$0xf0] %v1940_v53  ;;  %v1922_v39 = vpack.c.bf16 %v1915_v52, %v1914_v55 }
 0x64c   : > { %v1950_v40 = vrot.slane %v1924_v47, 4  ;;  %v2046_v37 = vrot.slane %v4583_v56, 4  ;;  %v2062_v29 = vsel %vm1019_vm4, %v2057_v43, %v2061_v30  ;;  %v2988_v30 = vld [vmem:[%s4786_s11] ss:$0 sm:$0xff] }
 0x64d   : > { %v1946_v34 = vrot.slane %v1922_v39, 4 }
 0x64e   : > { %1972 = vst [vmem:[#allocation3 + $0x40] sm:$0xf] %v1950_v40 }
 0x64f   : > { %v4586_v24 = vsel %vm1019_vm4, %v1942_v27, %v1946_v34  ;;  %v4589_v38 = vsel %vm1019_vm4, %v1946_v34, %v1950_v40 }
 0x650   : > { %v2051_v2 = vrot.slane %v4586_v24, 4  ;;  %v2055_v35 = vrot.slane %v4589_v38, 4 }
 0x652   : > { %v1974_v60 = vld [vmem:[#allocation3] sm:$0xff]  ;;  %v2052_v15 = vsel %vm1019_vm4, %v2046_v37, %v2051_v2  ;;  %v2056_v19 = vsel %vm1019_vm4, %v2051_v2, %v2055_v35 }
 0x653   : > { %v2006_v4 = vld [vmem:[#allocation3] sm:$0xf0]  ;;  %2333 = vmatmul.mubr.bf16.vlgmr.msra.gmra.mrb[12].mxu1 %v1974_v60 }
 0x654   : > { %v2045_v9 = vrot.slane %v2006_v4, 4  ;;  %2944 = vmatprep.mubr.msk.bf16.mxu1 %vm525_vm1, %v4566_v41  ;;  %3275 = vmatpush3.bf16.msra.mxu1 %v3534_v11 }
 0x655   : > { %3276 = vmatprep.subr.bf16.mxu1 %v3539_v12  ;;  %v2008_v22 = vld [vmem:[#allocation3 + $0x40] sm:$0xf] }
 0x656   : > { %v2047_v14 = vsel %vm1019_vm4, %v2045_v9, %v2046_v37  ;;  %v2059_v11 = vrot.slane %v2008_v22, 4 }
 0x657   : > { %2184 = vmatmul.mubr.bf16.vlgmr.msra.gmra.mrb[8].mxu0 %v2047_v14 }
 0x658   : > { %2468 = vmatpush1.bf16.msra.mxu0 %v3526_v51  ;;  %2928 = vmatprep.mubr.msk.bf16.mxu0 %vm525_vm1, %v2054_v23  ;;  %v2060_v54 = vsel %vm1019_vm4, %v2055_v35, %v2059_v11 }
 0x659   : > { %2469 = vmatprep.subr.bf16.mxu0 %v3681_v59  ;;  %3277 = vmatpush3.bf16.msra.mxu1 %v3539_v12 }
 0x65b   : > { %2341 = vmatmul.mubr.bf16.gmra.mrb[16].mxu1 %v4583_v56 }
 0x65c   : > { %2470 = vmatpush1.bf16.msra.mxu0 %v3527_v57  ;;  %2945 = vmatprep.mubr.msk.bf16.mxu1 %vm525_vm1, %v4591_v48 }
 0x65d   : > { %2471 = vmatprep.subr.bf16.mxu0 %v3681_v59 }
 0x65f   : > { %2192 = vmatmul.mubr.bf16.gmra.mrb[12].mxu0 %v2052_v15 }
 0x660   : > { %2472 = vmatpush1.bf16.msra.mxu0 %v3528_v21  ;;  %2929 = vmatprep.mubr.msk.bf16.mxu0 %vm525_vm1, %v2058_v26 }
 0x661   : > { %2473 = vmatprep.subr.bf16.mxu0 %v3681_v59 }
 0x663   : > { %2349 = vmatmul.mubr.bf16.gmra.mrb[20].mxu1 %v4586_v24 }
 0x664   : > { %2474 = vmatpush1.bf16.msra.mxu0 %v3529_v62  ;;  %2946 = vmatprep.mubr.msk.bf16.mxu1 %vm525_vm1, %v1981_v42 }
 0x665   : > { %2475 = vmatprep.subr.bf16.mxu0 %v3681_v59 }
 0x667   : > { %2200 = vmatmul.mubr.bf16.gmra.mrb[16].mxu0 %v2056_v19  ;;  %v2987_v19 = vld [vmem:[%s4784_s9] ss:$0 sm:$0xff] }
 0x668   : > { %2476 = vmatpush1.bf16.msra.mxu0 %v3530_v61  ;;  %2930 = vmatprep.mubr.msk.bf16.mxu0 %vm525_vm1, %v2062_v29 }
 0x669   : > { %2477 = vmatprep.subr.bf16.mxu0 %v3681_v59 }
 0x66b   : > { %2357 = vmatmul.mubr.bf16.gmra.mrb[24].mxu1 %v4589_v38 }
 0x66c   : > { %2478 = vmatpush1.bf16.msra.mxu0 %v3531_v32  ;;  %3278 = vmatprep.mubr.msk.bf16.mxu1 %vm698_vm9, %v3817_v5  ;;  %v3536_v5 = vld [vmem:[%s4783_s8 + $0x108] sm:$0xff]  }
 0x66d   : > { %2479 = vmatprep.subr.bf16.mxu0 %v3681_v59 }
 0x66f   : > { %2208 = vmatmul.mubr.bf16.gmra.mrb[20].mxu0 %v2060_v54 }
 0x670   : > { %2480 = vmatpush1.bf16.msra.mxu0 %v3532_v3  ;;  %2983 = vmatprep.mubr.msk.bf16.mxu0 %vm525_vm1, %v4566_v41  ;;  %v3537_v41 = vld [vmem:[%s4783_s8 + $0x110] sm:$0xff]  }
 0x671   : > { %2481 = vmatprep.subr.bf16.mxu0 %v3681_v59 }
 0x673   : > { %3279 = vmatmul.mubr.msk.bf16.vlgmr.msra.gmra.mrb[28].mxu1 %vm698_vm9, %v3819_v6  ;;  %v3538_v6 = vld [vmem:[%s4783_s8 + $0x118] sm:$0xff]  }
 0x674   : > { %2482 = vmatpush1.bf16.msra.mxu0 %v3533_v31  ;;  %3282 = vmatprep.mubr.msk.bf16.mxu1 %vm698_vm9, %v3821_v7  ;;  %v2366_v7 = vld [vmem:[#allocation3 + $0x48] sm:$0xff] }
 0x675   : > { %2483 = vmatprep.subr.bf16.mxu0 %v3681_v59 }
 0x678   : > { %2484 = vmatpush1.bf16.msra.mxu0 %v3535_v45 }
 0x679   : > { %2485 = vmatprep.subr.bf16.mxu0 %v3681_v59 }
 0x67b   : > { %3283 = vmatmul.mubr.msk.bf16.gmra.mrb[32].mxu1 %vm698_vm9, %v3836_v13  ;;  %v2365_v13 = vld [vmem:[#allocation3 + $0x40] sm:$0xff] }
 0x67c   : > { %2486 = vmatpush1.bf16.msra.mxu0 %v3536_v5 }
 0x67d   : > { %2487 = vmatprep.subr.bf16.mxu0 %v3681_v59 }
 0x680   : > { %2488 = vmatpush1.bf16.msra.mxu0 %v3537_v41 }
 0x681   : > { %2489 = vmatprep.subr.bf16.mxu0 %v3681_v59 }
 0x684   : > { %2490 = vmatpush1.bf16.msra.mxu0 %v3538_v6 }
 0x687   : > { %2500 = vmatmul.mubr.bf16.vlgmr.msra.gmra.mrb[24].mxu0 %v4583_v56 }
 0x688   : > { %2984 = vmatprep.mubr.msk.bf16.mxu0 %vm525_vm1, %v4591_v48 }
 0x68f   : > { %2508 = vmatmul.mubr.bf16.gmra.mrb[28].mxu0 %v4586_v24 }
 0x690   : > { %2985 = vmatprep.mubr.msk.bf16.mxu0 %vm525_vm1, %v1981_v42 }
 0x697   : > { %2516 = vmatmul.mubr.bf16.gmra.mrb[32].mxu0 %v4589_v38 }
 0x698   : > { %2986 = vmatprep.mubr.msk.bf16.mxu0 %vm525_vm1, %v2366_v7 }
 0x69f   : > { %2524 = vmatmul.mubr.bf16.gmra.mrb[36].mxu0 %v2365_v13 }
 0x726   : > { %v2334_v20 = vpop.f32.mrb[12].mxu1 }
 0x727   : > { %v2336_v18 = vpop.f32.mrb[13].mxu1 }
 0x728   : > { %v2337_v59 = vpop.f32.mrb[14].mxu1 }
 0x729   : > { %v2339_v33 = vpop.f32.mrb[15].mxu1 }
 0x72a   : > { %v2185_v50 = vpop.f32.mrb[8].mxu0 }
 0x72b   : > { %v2335_v0 = vadd.f32 %v2334_v20, %v2185_v50  ;;  %v2187_v58 = vpop.f32.mrb[9].mxu0 }
 0x72c   : > { %v2188_v44 = vpop.f32.mrb[10].mxu0 }
 0x72d   : > { %v2338_v8 = vadd.f32 %v2337_v59, %v2188_v44  ;;  %v2190_v27 = vpop.f32.mrb[11].mxu0 }
 0x72e   : > { %v2342_v16 = vpop.f32.mrb[16].mxu1 }
 0x72f   : > { %v2344_v17 = vpop.f32.mrb[17].mxu1 }
 0x730   : > { %v2345_v25 = vpop.f32.mrb[18].mxu1 }
 0x731   : > { %v2347_v46 = vpop.f32.mrb[19].mxu1 }
 0x732   : > { %v2193_v1 = vpop.f32.mrb[12].mxu0 }
 0x733   : > { %v2343_v28 = vadd.f32 %v2342_v16, %v2193_v1  ;;  %v2195_v53 = vpop.f32.mrb[13].mxu0 }
 0x734   : > { %v2196_v10 = vpop.f32.mrb[14].mxu0 }
 0x735   : > { %v2346_v63 = vadd.f32 %v2345_v25, %v2196_v10  ;;  %v2198_v47 = vpop.f32.mrb[15].mxu0 }
 0x736   : > { %v2350_v52 = vpop.f32.mrb[20].mxu1 }
 0x737   : > { %v2352_v55 = vpop.f32.mrb[21].mxu1 }
 0x738   : > { %v2353_v56 = vpop.f32.mrb[22].mxu1 }
 0x739   : > { %v2355_v39 = vpop.f32.mrb[23].mxu1 }
 0x73a   : > { %v2201_v40 = vpop.f32.mrb[16].mxu0 }
 0x73b   : > { %v2351_v34 = vadd.f32 %v2350_v52, %v2201_v40  ;;  %v2203_v24 = vpop.f32.mrb[17].mxu0 }
 0x73c   : > { %v2204_v38 = vpop.f32.mrb[18].mxu0 }
 0x73d   : > { %v4682_v48 = vadd.f32 %v2353_v56, %v2204_v38  ;;  %v2206_v37 = vpop.f32.mrb[19].mxu0 }
 0x73e   : > { %v2358_v2 = vpop.f32.mrb[24].mxu1 }
 0x73f   : > { %v2360_v12 = vpop.f32.mrb[25].mxu1 }
 0x740   : > { %v2361_v60 = vpop.f32.mrb[26].mxu1 }
 0x741   : > { %v2363_v4 = vpop.f32.mrb[27].mxu1 }
 0x742   : > { %v2209_v49 = vpop.f32.mrb[20].mxu0 }
 0x743   : > { %v4684_v15 = vadd.f32 %v2358_v2, %v2209_v49  ;;  %v2211_v9 = vpop.f32.mrb[21].mxu0 }
 0x744   : > { %v2212_v51 = vpop.f32.mrb[22].mxu0 }
 0x745   : > { %v4686_v14 = vadd.f32 %v2361_v60, %v2212_v51  ;;  %v2214_v23 = vpop.f32.mrb[23].mxu0 }
 0x746   : > { %v3280_v57 = vpop.f32.mrb[28].mxu1 }
 0x747   : > { %v2644_v42 = vpop.f32.mrb[29].mxu1  ;;  %v2653_v20 = vadd.f32 %v3280_v57, %v2988_v30 }
 0x748   : > { %v3281_v43 = vpop.f32.mrb[30].mxu1  ;;  %v2645_v32 = vadd.f32 %v2988_v30, %v2644_v42 }
 0x749   : > { %v2647_v21 = vpop.f32.mrb[31].mxu1 }
 0x74a   : > { %v2648_v45 = vadd.f32 %v2988_v30, %v2647_v21 }
 0x74e   : > { %v3284_v26 = vpop.f32.mrb[32].mxu1 }
 0x74f   : > { %v2660_v62 = vpop.f32.mrb[33].mxu1  ;;  %v2669_v2 = vadd.f32 %v3284_v26, %v2988_v30 }
 0x750   : > { %v4688_v36 = vpop.f32.mrb[34].mxu1  ;;  %v2661_v10 = vadd.f32 %v2988_v30, %v2660_v62 }
 0x751   : > { %v2663_v35 = vpop.f32.mrb[35].mxu1  ;;  %v2672_v51 = vadd.f32 %v4688_v36, %v2988_v30 }
 0x752   : > { %v2664_v56 = vadd.f32 %v2988_v30, %v2663_v35 }
 0x75a   : > { %v2501_v61 = vpop.f32.mrb[24].mxu0 }
 0x75b   : > { %v2532_v29 = vadd.f32 %v2501_v61, %v2335_v0  ;;  %v2503_v22 = vpop.f32.mrb[25].mxu0  ;;  %v2656_v0 = vadd.f32 %v3281_v43, %v2988_v30 }
 0x75c   : > { %v2504_v11 = vpop.f32.mrb[26].mxu0 }
 0x75d   : > { %v2547_v3 = vadd.f32 %v2987_v19, %v2532_v29  ;;  %v2533_v54 = vadd.f32 %v2504_v11, %v2338_v8  ;;  %v2506_v31 = vpop.f32.mrb[27].mxu0 }
 0x75f   : > { %v2548_v5 = vadd.f32 %v2987_v19, %v2533_v54  ;;  %v2675_v41 = vadd.f32 %v2645_v32, %v2547_v3 }
 0x761   : > { %v3013_v6 = vpack.c.bf16 %v2675_v41, %v2675_v41  ;;  %v2676_v7 = vadd.f32 %v2648_v45, %v2548_v5 }
 0x762   : > { %v2509_v13 = vpop.f32.mrb[28].mxu0 }
 0x763   : > { %2715 = vst.msk [vmem:[%s4699_s28] sm:$0xf] %vm1927_vm10, %v3013_v6  ;;  %v3014_v18 = vpack.c.bf16 %v2676_v7, %v2676_v7  ;;  %v2534_v59 = vadd.f32 %v2509_v13, %v2343_v28  ;;  %v2511_v33 = vpop.f32.mrb[29].mxu0 }
 0x764   : > { %v2512_v50 = vpop.f32.mrb[30].mxu0 }
 0x765   : > { %2716 = vst.msk [vmem:[%s4699_s28 + $0x4] sm:$0xf] %vm1927_vm10, %v3014_v18  ;;  %v2549_v58 = vadd.f32 %v2987_v19, %v2534_v59  ;;  %v2535_v44 = vadd.f32 %v2512_v50, %v2346_v63  ;;  %v2514_v8 = vpop.f32.mrb[31].mxu0 }
 0x767   : > { %v2677_v27 = vadd.f32 %v2653_v20, %v2549_v58  ;;  %v2550_v16 = vadd.f32 %v2987_v19, %v2535_v44 }
 0x769   : > { %v3015_v17 = vpack.c.bf16 %v2677_v27, %v2677_v27  ;;  %v2678_v25 = vadd.f32 %v2656_v0, %v2550_v16 }
 0x76a   : > { %v2517_v46 = vpop.f32.mrb[32].mxu0 }
 0x76b   : > { %2717 = vst.msk [vmem:[%s4699_s28 + $0x8] sm:$0xf] %vm1927_vm10, %v3015_v17  ;;  %v3016_v1 = vpack.c.bf16 %v2678_v25, %v2678_v25  ;;  %v2536_v53 = vadd.f32 %v2517_v46, %v2351_v34  ;;  %v2519_v28 = vpop.f32.mrb[33].mxu0 }
 0x76c   : > { %v2520_v47 = vpop.f32.mrb[34].mxu0 }
 0x76d   : > { %2718 = vst.msk [vmem:[%s4699_s28 + $0xc] sm:$0xf] %vm1927_vm10, %v3016_v1  ;;  %v2551_v52 = vadd.f32 %v2987_v19, %v2536_v53  ;;  %v2537_v63 = vadd.f32 %v2520_v47, %v4682_v48  ;;  %v2522_v55 = vpop.f32.mrb[35].mxu0 }
 0x76f   : > { %v2552_v39 = vadd.f32 %v2987_v19, %v2537_v63  ;;  %v2679_v40 = vadd.f32 %v2661_v10, %v2551_v52 }
 0x771   : > { %v3017_v24 = vpack.c.bf16 %v2679_v40, %v2679_v40  ;;  %v2680_v38 = vadd.f32 %v2664_v56, %v2552_v39 }
 0x772   : > { %v2525_v37 = vpop.f32.mrb[36].mxu0 }
 0x773   : > { %2719 = vst.msk [vmem:[%s4699_s28 + $0x10] sm:$0xf] %vm1927_vm10, %v3017_v24  ;;  %v3018_v34 = vpack.c.bf16 %v2680_v38, %v2680_v38  ;;  %v2538_v12 = vadd.f32 %v2525_v37, %v4684_v15  ;;  %v2527_v60 = vpop.f32.mrb[37].mxu0 }
 0x774   : > { %v2528_v4 = vpop.f32.mrb[38].mxu0 }
 0x775   : > { %2720 = vst.msk [vmem:[%s4699_s28 + $0x14] sm:$0xf] %vm1927_vm10, %v3018_v34  ;;  %v2553_v48 = vadd.f32 %v2987_v19, %v2538_v12  ;;  %v2539_v49 = vadd.f32 %v2528_v4, %v4686_v14  ;;  %v2530_v9 = vpop.f32.mrb[39].mxu0 }
 0x777   : > { %v2681_v23 = vadd.f32 %v2669_v2, %v2553_v48  ;;  %v2554_v57 = vadd.f32 %v2987_v19, %v2539_v49 }
 0x779   : > { %v3019_v42 = vpack.c.bf16 %v2681_v23, %v2681_v23  ;;  %v2682_v43 = vadd.f32 %v2672_v51, %v2554_v57 }
 0x77b   : > { %2721 = vst.msk [vmem:[%s4699_s28 + $0x18] sm:$0xf] %vm1927_vm10, %v3019_v42  ;;  %v3020_v15 = vpack.c.bf16 %v2682_v43, %v2682_v43 }
 0x77d   : > { %2722 = vst.msk [vmem:[%s4699_s28 + $0x1c] sm:$0xf] %vm1927_vm10, %v3020_v15 }
 0x77e   : > { %3625 = shalt.err (!%p3622_p3)
}
 0x77f   : > { %s3626_s15 = scalar_lea.hbm %s4722_s29, 512  ;;  %s3630_s18 = scalar_lea.hbm %s4787_s12, 1024 }
 0x780   : > { %p3627_p4 = scmp.ne.s32.totalorder %s4722_s29, %s3626_s15  ;;  %p3631_p9 = scmp.lt.u32.totalorder %s4722_s29, %s4787_s12 }
 0x781   : > { %p3632_p10 = scmp.lt.u32.totalorder %s3630_s18, %s3626_s15  ;;  %p3634_p12 = scmp.lt.u32.totalorder %s3626_s15, %s4722_s29 }
 0x782   : > { %p3628_p7 = pnand %p3627_p4, %p3789_p5 }
 0x783   : > { %p3633_p11 = por %p3632_p10, %p3631_p9 }
 0x784   : > { %p3629_p8 = pneg %p3628_p7 }
 0x785   : > { %p3635_p13 = por %p3634_p12, %p3633_p11 }
 0x787   : > { %p3636_p0 = pnand %p3635_p13, %p3629_p8 }
 0x789   : > { %3639 = shalt.err (!%p3636_p0)
}
 0x78a   : > { %s3685_s26 = smov 4  }
 0x78b   : > { %3372 = dma.vmem_to_hbm [thread:$0]  (%p3789_p5), %s4726_s17, 512, %s4722_s29, %s4732_s25, %s4809_s16, %s4809_s16, %s3685_s26  }
 0x78c PF: > { %p3378_p1 = scmp.ge.s32.totalorder %s3674_s24, 2  ;;  %s2752_s0 = sand.u32 1, %s3662_s21  }
 0x78d   : > { %s2753_s1 = scalar_lea.sflag [#allocation5], %s2752_s0 }
 0x78e   : > { %p3375_p2 = pnand %p3378_p1, %p3793_p6 }
 0x790   : > { %3657 = dma.done.wait (!%p3375_p2), %s2753_s1, 512  }
 0x791   : > { %3659 = vsyncadd (!%p3375_p2), %s2753_s1, 4294966784  ;;  %p22_p3 = scmp.ge.s32.totalorder %s3776_s27, 4   ;;  %s4810_s21 = smov %s3666_s22 }
 0x792   : > { %s4811_s22 = smov %s3670_s23  ;;  %s4812_s23 = smov %s3787_s30 }
 0x793   : > { %s4813_s24 = smov %s3776_s27  ;;  %24 = sbr.rel (!%p22_p3) target bundleno = 6 (0x6), region = 110 }
 0x79a   :  { %2758 = vsyncpa [#allocation5], 1 }
 0x79b   :  { %2760 = vsyncpa [#allocation5 + $0x1], 1 }

</bundles_post_ra>
